<compile_context>
chip_gen: v6e
topology: v6e:2x2x1
jax: 0.10.0
libtpu: 0.0.40
codegen_flags: <defaults>
</compile_context>

<pallas_src>
import functools

import jax
import jax.numpy as jnp
from jax.experimental import pallas as pl
from jax.experimental.pallas import tpu as pltpu

N_CLASS = 26       # len('abcdefghijklmnopqrstuvwxyz')
N_HIDDEN = 128
OUT_PAD = 128      # lane-dense padded output width (>= N_CLASS)


def _round_up(x, m):
    return -(-x // m) * m


def _reorder_gates(w4h):
    """Permute last-dim gate blocks from PyTorch (i,f,g,o) to (i,f,o,g)."""
    i, f, g, o = jnp.split(w4h, 4, axis=-1)
    return jnp.concatenate([i, f, o, g], axis=-1)


def _choose_t_chunk(seq, desired):
    """Prefer a chunk length dividing seq (no wasted padded serial steps)."""
    t = max(1, min(desired, seq))
    if seq % t == 0:
        return t
    for d in range(t, 0, -1):
        if seq % d == 0:
            return d if d >= max(8, t // 2) else t
    return t


def _lstm_kernel(x_ref, wih_ref, bg_ref, whh_ref, w_ref, bo_ref, out_ref,
                 h_scr, c_scr, gx_scr, *, seq_len, needs_mask, unroll, slab_t):
    """Grid = (batch_tiles [parallel], seq_chunks [arbitrary]).

    x_ref  : (t_chunk, b_tile, 26) f32  time-major input chunk
    wih_ref: (26, 4H)   compute_dtype  (gate order i,f,o,g)
    bg_ref : (1, 4H)    f32            b_ih + b_hh (reordered)
    whh_ref: (H, 4H)    compute_dtype
    w_ref  : (H, OUT_PAD) compute_dtype (zero-padded past 26)
    bo_ref : (1, OUT_PAD) f32
    out_ref: (b_tile, OUT_PAD) f32
    h_scr, c_scr: (b_tile, H) f32 recurrent state (persists across chunks)
    gx_scr : (t_chunk*b_tile, 4H) f32 per-chunk input pre-activations
    """
    chunk_idx = pl.program_id(1)
    t_chunk, b_tile, n_in = x_ref.shape
    H = N_HIDDEN
    cdt = whh_ref.dtype

    @pl.when(chunk_idx == 0)
    def _init():
        h_scr[...] = jnp.zeros_like(h_scr)
        c_scr[...] = jnp.zeros_like(c_scr)

    # ---- whole-chunk input projection (off the serial critical path) ----
    wih = wih_ref[...]
    bias = bg_ref[...]
    n_slabs = t_chunk // slab_t
    slab_rows = slab_t * b_tile
    for s in range(n_slabs):
        xs = x_ref[pl.ds(s * slab_t, slab_t), :, :]          # (slab_t, b_tile, C)
        xs = xs.reshape(slab_rows, n_in).astype(cdt)
        gx_scr[pl.ds(s * slab_rows, slab_rows), :] = (
            jnp.dot(xs, wih, preferred_element_type=jnp.float32) + bias)

    whh = whh_ref[...]

    # ---- serial recurrence: only h @ W_hh on the critical path ----
    def step(t, carry):
        h, c = carry
        row = pl.multiple_of(t * b_tile, b_tile)
        gates = gx_scr[pl.ds(row, b_tile), :] + jnp.dot(
            h.astype(cdt), whh, preferred_element_type=jnp.float32)
        sig = jax.nn.sigmoid(gates[:, :3 * H])               # [i | f | o]
        g_g = jnp.tanh(gates[:, 3 * H:])
        i_g = sig[:, 0 * H:1 * H]
        f_g = sig[:, 1 * H:2 * H]
        o_g = sig[:, 2 * H:3 * H]
        c_new = f_g * c + i_g * g_g
        h_new = o_g * jnp.tanh(c_new)
        if needs_mask:
            # End-padded timesteps (only possible in the last chunk): keep
            # the previous state.  Exact for zero OR nonzero states.
            valid = (chunk_idx * t_chunk + t) < seq_len
            h_new = jnp.where(valid, h_new, h)
            c_new = jnp.where(valid, c_new, c)
        return (h_new, c_new)

    h, c = jax.lax.fori_loop(0, t_chunk, step, (h_scr[...], c_scr[...]),
                             unroll=unroll)
    h_scr[...] = h
    c_scr[...] = c

    @pl.when(chunk_idx == pl.num_programs(1) - 1)
    def _finalize():
        out_ref[...] = (jnp.dot(h.astype(cdt), w_ref[...],
                                preferred_element_type=jnp.float32)
                        + bo_ref[...])


def text_lstm_forward(x, params, *, compute_dtype=jnp.bfloat16,
                      t_chunk=128, unroll=8):
    """x: (batch, seq, n_class) float32. Returns (batch, n_class) float32."""
    batch, seq, n_class = x.shape
    assert n_class == N_CLASS
    H, H4 = N_HIDDEN, 4 * N_HIDDEN

    # ---- batch tiling: fill MXU rows; 16-row alignment for bf16 packing ----
    row_align = 16 if compute_dtype == jnp.bfloat16 else 8
    b_tile = min(256, _round_up(batch, row_align))
    num_btiles = -(-batch // b_tile)
    b_pad = num_btiles * b_tile

    # ---- time chunking (grid only over chunks; serial loop in-kernel) ----
    # Cap t_chunk*b_tile so the (rows, 4H) f32 gate scratch stays <= 4 MiB.
    t_chunk = min(t_chunk, max(8, 2048 // b_tile))
    t_chunk = _choose_t_chunk(seq, t_chunk)
    num_chunks = -(-seq // t_chunk)
    seq_pad = num_chunks * t_chunk
    needs_mask = seq_pad != seq

    # Slab size (timesteps) for the per-chunk input-projection matmul.
    slab_t = max(1, min(t_chunk, 256 // b_tile))
    while t_chunk % slab_t:
        slab_t -= 1

    # ---- operand prep: time-major x, gate order [i, f, o, g] ----
    x_tm = jnp.transpose(x, (1, 0, 2)).astype(jnp.float32)       # (seq, batch, C)
    x_tm = jnp.pad(x_tm, ((0, seq_pad - seq), (0, b_pad - batch), (0, 0)))

    wih = _reorder_gates(params["weight_ih"].T).astype(compute_dtype)   # (C, 4H)
    whh = _reorder_gates(params["weight_hh"].T).astype(compute_dtype)   # (H, 4H)
    b_g = _reorder_gates(
        (params["bias_ih"] + params["bias_hh"]).reshape(1, H4)
    ).astype(jnp.float32)                                               # (1, 4H)
    w_out = jnp.pad(params["W"],
                    ((0, 0), (0, OUT_PAD - N_CLASS))).astype(compute_dtype)
    b_out = jnp.pad(params["b"].reshape(1, N_CLASS),
                    ((0, 0), (0, OUT_PAD - N_CLASS))).astype(jnp.float32)

    kernel = functools.partial(
        _lstm_kernel, seq_len=seq, needs_mask=needs_mask,
        unroll=max(1, min(unroll, t_chunk)), slab_t=slab_t)

    grid_spec = pltpu.PrefetchScalarGridSpec(
        num_scalar_prefetch=0,
        grid=(num_btiles, num_chunks),
        in_specs=[
            pl.BlockSpec((t_chunk, b_tile, N_CLASS), lambda b, c: (c, b, 0)),
            pl.BlockSpec((N_CLASS, H4), lambda b, c: (0, 0)),
            pl.BlockSpec((1, H4), lambda b, c: (0, 0)),
            pl.BlockSpec((N_HIDDEN, H4), lambda b, c: (0, 0)),
            pl.BlockSpec((N_HIDDEN, OUT_PAD), lambda b, c: (0, 0)),
            pl.BlockSpec((1, OUT_PAD), lambda b, c: (0, 0)),
        ],
        out_specs=pl.BlockSpec((b_tile, OUT_PAD), lambda b, c: (b, 0)),
        scratch_shapes=[
            pltpu.VMEM((b_tile, N_HIDDEN), jnp.float32),       # h state
            pltpu.VMEM((b_tile, N_HIDDEN), jnp.float32),       # c state
            pltpu.VMEM((t_chunk * b_tile, H4), jnp.float32),   # gates_x chunk
        ],
    )

    out_padded = pl.pallas_call(
        kernel,
        out_shape=jax.ShapeDtypeStruct((b_pad, OUT_PAD), jnp.float32),
        grid_spec=grid_spec,
        compiler_params=pltpu.CompilerParams(
            # batch tiles independent (v7x megacore); chunks sequential in time
            dimension_semantics=("parallel", "arbitrary"),
            vmem_limit_bytes=32 * 1024 * 1024),
    )(x_tm, wih, b_g, whh, w_out, b_out)

    return out_padded[:batch, :N_CLASS]


def _init_params(key):
    ks = jax.random.split(key, 6)
    scale = 1.0 / jnp.sqrt(N_HIDDEN)
    return {
        # PyTorch nn.LSTM parameter shapes (gate order i, f, g, o)
        "weight_ih": jax.random.uniform(ks[0], (4 * N_HIDDEN, N_CLASS),
                                        jnp.float32, -scale, scale),
        "weight_hh": jax.random.uniform(ks[1], (4 * N_HIDDEN, N_HIDDEN),
                                        jnp.float32, -scale, scale),
        "bias_ih": jax.random.uniform(ks[2], (4 * N_HIDDEN,),
                                      jnp.float32, -scale, scale),
        "bias_hh": jax.random.uniform(ks[3], (4 * N_HIDDEN,),
                                      jnp.float32, -scale, scale),
        # self.W = randn([n_hidden, n_class]); self.b = randn([n_class])
        "W": jax.random.normal(ks[4], (N_HIDDEN, N_CLASS), jnp.float32),
        "b": jax.random.normal(ks[5], (N_CLASS,), jnp.float32),
    }


def _reference_forward(x, params):
    """Pure-JAX reference identical to the PyTorch forward semantics."""
    x_tm = jnp.transpose(x, (1, 0, 2))  # (seq, batch, n_class)
    wih, whh = params["weight_ih"], params["weight_hh"]
    bias = params["bias_ih"] + params["bias_hh"]
    H = N_HIDDEN
    hp = jax.lax.Precision.HIGHEST

    def step(carry, x_t):
        h, c = carry
        gates = (jnp.dot(x_t, wih.T, precision=hp)
                 + jnp.dot(h, whh.T, precision=hp) + bias)
        i = jax.nn.sigmoid(gates[:, 0 * H:1 * H])
        f = jax.nn.sigmoid(gates[:, 1 * H:2 * H])
        g = jnp.tanh(gates[:, 2 * H:3 * H])
        o = jax.nn.sigmoid(gates[:, 3 * H:4 * H])
        c = f * c + i * g
        h = o * jnp.tanh(c)
        return (h, c), None

    batch = x.shape[0]
    h0 = jnp.zeros((batch, H), jnp.float32)
    (h_last, _), _ = jax.lax.scan(step, (h0, h0), x_tm)
    return jnp.dot(h_last, params["W"], precision=hp) + params["b"]


if __name__ == "__main__":
    key = jax.random.PRNGKey(0)
    kp, kx1, kx2 = jax.random.split(key, 3)
    params = _init_params(kp)

    # ---- test 1/2: batch=2, seq=8 (single chunk) ----
    batch, seq = 2, 8
    idx = jax.random.randint(kx1, (batch, seq), 0, N_CLASS)
    x = jax.nn.one_hot(idx, N_CLASS, dtype=jnp.float32)
    ref = _reference_forward(x, params)

    # bf16 matmul operands (default): loose tolerance, state stays f32.
    out_bf16 = jax.block_until_ready(text_lstm_forward(x, params))
    assert out_bf16.shape == (batch, N_CLASS)
    assert jnp.allclose(out_bf16, ref, atol=0.5, rtol=0.1), "bf16 mismatch"

    # f32 matmul operands: tight check against the high-precision reference.
    out_f32 = jax.block_until_ready(
        text_lstm_forward(x, params, compute_dtype=jnp.float32))
    assert jnp.allclose(out_f32, ref, atol=2e-3, rtol=2e-3), "f32 mismatch"

    # ---- test 3: multi-chunk + end-pad masking path (seq=13 prime, t_chunk=4) ----
    batch3, seq3 = 3, 13
    idx3 = jax.random.randint(kx2, (batch3, seq3), 0, N_CLASS)
    x3 = jax.nn.one_hot(idx3, N_CLASS, dtype=jnp.float32)
    ref3 = _reference_forward(x3, params)
    out3 = jax.block_until_ready(text_lstm_forward(x3, params, t_chunk=4))
    assert out3.shape == (batch3, N_CLASS)
    assert jnp.allclose(out3, ref3, atol=0.5, rtol=0.1), "multi-chunk mismatch"

    print("KERNEL_OK")
</pallas_src>

<mosaic_0001>
module attributes {stable_mosaic.version = 11 : i64} {
  func.func @_lstm_kernel(%arg0: i32, %arg1: i32, %arg2: memref<8x16x26xf32, #tpu.memory_space<vmem>>, %arg3: memref<26x512xbf16, #tpu.memory_space<vmem>>, %arg4: memref<1x512xf32, #tpu.memory_space<vmem>>, %arg5: memref<128x512xbf16, #tpu.memory_space<vmem>>, %arg6: memref<128x128xbf16, #tpu.memory_space<vmem>>, %arg7: memref<1x128xf32, #tpu.memory_space<vmem>>, %arg8: memref<16x128xf32, #tpu.memory_space<vmem>>, %arg9: memref<16x128xf32, #tpu.memory_space<vmem>>, %arg10: memref<16x128xf32, #tpu.memory_space<vmem>>, %arg11: memref<128x512xf32, #tpu.memory_space<vmem>>) attributes {dimension_semantics = [#tpu.dimension_semantics<parallel>, #tpu.dimension_semantics<arbitrary>], iteration_bounds = array<i64: 1, 1>, scalar_prefetch = 0 : i64, scratch_operands = 3 : i64, tpu.core_type = #tpu.core_type<tc>, window_params = [{transform_indices = @transform_0, window_bounds = array<i64: 8, 16, 26>}, {pipeline_mode = #tpu.pipeline_mode<synchronous>, transform_indices = @transform_1, window_bounds = array<i64: 26, 512>}, {pipeline_mode = #tpu.pipeline_mode<synchronous>, transform_indices = @transform_2, window_bounds = array<i64: 1, 512>}, {pipeline_mode = #tpu.pipeline_mode<synchronous>, transform_indices = @transform_3, window_bounds = array<i64: 128, 512>}, {pipeline_mode = #tpu.pipeline_mode<synchronous>, transform_indices = @transform_4, window_bounds = array<i64: 128, 128>}, {pipeline_mode = #tpu.pipeline_mode<synchronous>, transform_indices = @transform_5, window_bounds = array<i64: 1, 128>}, {transform_indices = @transform_6, window_bounds = array<i64: 16, 128>}]} {
    %c0_i32 = arith.constant 0 : i32
    %0 = arith.cmpi eq, %arg1, %c0_i32 : i32
    %1 = arith.extui %0 : i1 to i32
    %c0_i32_0 = arith.constant 0 : i32
    %2 = arith.cmpi ne, %1, %c0_i32_0 : i32
    scf.if %2 {
      %cst_53 = arith.constant 0.000000e+00 : f32
      %204 = vector.broadcast %cst_53 : f32 to vector<16x128xf32>
      %c0_54 = arith.constant 0 : index
      %c0_55 = arith.constant 0 : index
      %205 = vector.load %arg9[%c0_54, %c0_55] : memref<16x128xf32, #tpu.memory_space<vmem>>, vector<16x128xf32>
      tpu.vector_store %arg9[%c0_54, %c0_55], %204 {strides = array<i32>} : memref<16x128xf32, #tpu.memory_space<vmem>>, vector<16x128xf32>,
      %cst_56 = arith.constant 0.000000e+00 : f32
      %206 = vector.broadcast %cst_56 : f32 to vector<16x128xf32>
      %c0_57 = arith.constant 0 : index
      %c0_58 = arith.constant 0 : index
      %207 = vector.load %arg10[%c0_57, %c0_58] : memref<16x128xf32, #tpu.memory_space<vmem>>, vector<16x128xf32>
      tpu.vector_store %arg10[%c0_57, %c0_58], %206 {strides = array<i32>} : memref<16x128xf32, #tpu.memory_space<vmem>>, vector<16x128xf32>,
    } else {
    }
    %c0 = arith.constant 0 : index
    %c0_1 = arith.constant 0 : index
    %3 = vector.load %arg3[%c0, %c0_1] : memref<26x512xbf16, #tpu.memory_space<vmem>>, vector<26x512xbf16>
    %c0_2 = arith.constant 0 : index
    %c0_3 = arith.constant 0 : index
    %4 = vector.load %arg4[%c0_2, %c0_3] : memref<1x512xf32, #tpu.memory_space<vmem>>, vector<1x512xf32>
    %c0_4 = arith.constant 0 : index
    %c0_5 = arith.constant 0 : index
    %c0_6 = arith.constant 0 : index
    %5 = vector.load %arg2[%c0_4, %c0_5, %c0_6] : memref<8x16x26xf32, #tpu.memory_space<vmem>>, vector<8x16x26xf32>
    %6 = vector.shape_cast %5 : vector<8x16x26xf32> to vector<128x26xf32>
    %7 = arith.truncf %6 : vector<128x26xf32> to vector<128x26xbf16>
    %cst = arith.constant dense<0.000000e+00> : vector<128x512xf32>
    %8 = tpu.matmul %7, %3, %cst {dimension_numbers = #tpu.dot_dimension_numbers<[1], [0], [0], [1], [0, 0, 1, 1], [], []>} : vector<128x26xbf16>, vector<26x512xbf16>, vector<128x512xf32> -> vector<128x512xf32>
    %9 = vector.broadcast %4 : vector<1x512xf32> to vector<128x512xf32>
    %10 = arith.addf %8, %9 : vector<128x512xf32>
    %c0_7 = arith.constant 0 : index
    %c0_8 = arith.constant 0 : index
    %11 = vector.load %arg11[%c0_7, %c0_8] : memref<128x512xf32, #tpu.memory_space<vmem>>, vector<128x512xf32>
    tpu.vector_store %arg11[%c0_7, %c0_8], %10 {strides = array<i32>} : memref<128x512xf32, #tpu.memory_space<vmem>>, vector<128x512xf32>,
    %c0_9 = arith.constant 0 : index
    %c0_10 = arith.constant 0 : index
    %12 = vector.load %arg5[%c0_9, %c0_10] : memref<128x512xbf16, #tpu.memory_space<vmem>>, vector<128x512xbf16>
    %c0_11 = arith.constant 0 : index
    %c0_12 = arith.constant 0 : index
    %13 = vector.load %arg9[%c0_11, %c0_12] : memref<16x128xf32, #tpu.memory_space<vmem>>, vector<16x128xf32>
    %c0_13 = arith.constant 0 : index
    %c0_14 = arith.constant 0 : index
    %14 = vector.load %arg10[%c0_13, %c0_14] : memref<16x128xf32, #tpu.memory_space<vmem>>, vector<16x128xf32>
    %c0_i32_15 = arith.constant 0 : i32
    %c16_i32 = arith.constant 16 : i32
    %15 = arith.muli %c0_i32_15, %c16_i32 : i32
    %16 = tpu.assume_multiple %15, 16 : i32
    %17 = arith.index_cast %16 : i32 to index
    %c0_16 = arith.constant 0 : index
    %18 = vector.load %arg11[%17, %c0_16] : memref<128x512xf32, #tpu.memory_space<vmem>>, vector<16x512xf32>
    %19 = arith.truncf %13 : vector<16x128xf32> to vector<16x128xbf16>
    %cst_17 = arith.constant dense<0.000000e+00> : vector<16x512xf32>
    %20 = tpu.matmul %19, %12, %cst_17 {dimension_numbers = #tpu.dot_dimension_numbers<[1], [0], [0], [1], [0, 0, 1, 1], [], []>} : vector<16x128xbf16>, vector<128x512xbf16>, vector<16x512xf32> -> vector<16x512xf32>
    %21 = arith.addf %18, %20 : vector<16x512xf32>
    %22 = vector.extract_strided_slice %21 {offsets = [0, 0], sizes = [16, 384], strides = [1, 1]} : vector<16x512xf32> to vector<16x384xf32>
    %23 = arith.negf %22 : vector<16x384xf32>
    %24 = math.exp %23 : vector<16x384xf32>
    %cst_18 = arith.constant 1.000000e+00 : f32
    %25 = vector.broadcast %cst_18 : f32 to vector<16x384xf32>
    %26 = arith.addf %25, %24 : vector<16x384xf32>
    %27 = arith.divf %25, %26 : vector<16x384xf32>
    %28 = vector.extract_strided_slice %21 {offsets = [0, 384], sizes = [16, 128], strides = [1, 1]} : vector<16x512xf32> to vector<16x128xf32>
    %29 = math.tanh %28 : vector<16x128xf32>
    %30 = vector.extract_strided_slice %27 {offsets = [0, 0], sizes = [16, 128], strides = [1, 1]} : vector<16x384xf32> to vector<16x128xf32>
    %31 = vector.extract_strided_slice %27 {offsets = [0, 128], sizes = [16, 128], strides = [1, 1]} : vector<16x384xf32> to vector<16x128xf32>
    %32 = vector.extract_strided_slice %27 {offsets = [0, 256], sizes = [16, 128], strides = [1, 1]} : vector<16x384xf32> to vector<16x128xf32>
    %33 = arith.mulf %31, %14 : vector<16x128xf32>
    %34 = arith.mulf %30, %29 : vector<16x128xf32>
    %35 = arith.addf %33, %34 : vector<16x128xf32>
    %36 = math.tanh %35 : vector<16x128xf32>
    %37 = arith.mulf %32, %36 : vector<16x128xf32>
    %c1_i32 = arith.constant 1 : i32
    %c16_i32_19 = arith.constant 16 : i32
    %38 = arith.muli %c1_i32, %c16_i32_19 : i32
    %39 = tpu.assume_multiple %38, 16 : i32
    %40 = arith.index_cast %39 : i32 to index
    %c0_20 = arith.constant 0 : index
    %41 = vector.load %arg11[%40, %c0_20] : memref<128x512xf32, #tpu.memory_space<vmem>>, vector<16x512xf32>
    %42 = arith.truncf %37 : vector<16x128xf32> to vector<16x128xbf16>
    %cst_21 = arith.constant dense<0.000000e+00> : vector<16x512xf32>
    %43 = tpu.matmul %42, %12, %cst_21 {dimension_numbers = #tpu.dot_dimension_numbers<[1], [0], [0], [1], [0, 0, 1, 1], [], []>} : vector<16x128xbf16>, vector<128x512xbf16>, vector<16x512xf32> -> vector<16x512xf32>
    %44 = arith.addf %41, %43 : vector<16x512xf32>
    %45 = vector.extract_strided_slice %44 {offsets = [0, 0], sizes = [16, 384], strides = [1, 1]} : vector<16x512xf32> to vector<16x384xf32>
    %46 = arith.negf %45 : vector<16x384xf32>
    %47 = math.exp %46 : vector<16x384xf32>
    %cst_22 = arith.constant 1.000000e+00 : f32
    %48 = vector.broadcast %cst_22 : f32 to vector<16x384xf32>
    %49 = arith.addf %48, %47 : vector<16x384xf32>
    %50 = arith.divf %48, %49 : vector<16x384xf32>
    %51 = vector.extract_strided_slice %44 {offsets = [0, 384], sizes = [16, 128], strides = [1, 1]} : vector<16x512xf32> to vector<16x128xf32>
    %52 = math.tanh %51 : vector<16x128xf32>
    %53 = vector.extract_strided_slice %50 {offsets = [0, 0], sizes = [16, 128], strides = [1, 1]} : vector<16x384xf32> to vector<16x128xf32>
    %54 = vector.extract_strided_slice %50 {offsets = [0, 128], sizes = [16, 128], strides = [1, 1]} : vector<16x384xf32> to vector<16x128xf32>
    %55 = vector.extract_strided_slice %50 {offsets = [0, 256], sizes = [16, 128], strides = [1, 1]} : vector<16x384xf32> to vector<16x128xf32>
    %56 = arith.mulf %54, %35 : vector<16x128xf32>
    %57 = arith.mulf %53, %52 : vector<16x128xf32>
    %58 = arith.addf %56, %57 : vector<16x128xf32>
    %59 = math.tanh %58 : vector<16x128xf32>
    %60 = arith.mulf %55, %59 : vector<16x128xf32>
    %c2_i32 = arith.constant 2 : i32
    %c16_i32_23 = arith.constant 16 : i32
    %61 = arith.muli %c2_i32, %c16_i32_23 : i32
    %62 = tpu.assume_multiple %61, 16 : i32
    %63 = arith.index_cast %62 : i32 to index
    %c0_24 = arith.constant 0 : index
    %64 = vector.load %arg11[%63, %c0_24] : memref<128x512xf32, #tpu.memory_space<vmem>>, vector<16x512xf32>
    %65 = arith.truncf %60 : vector<16x128xf32> to vector<16x128xbf16>
    %cst_25 = arith.constant dense<0.000000e+00> : vector<16x512xf32>
    %66 = tpu.matmul %65, %12, %cst_25 {dimension_numbers = #tpu.dot_dimension_numbers<[1], [0], [0], [1], [0, 0, 1, 1], [], []>} : vector<16x128xbf16>, vector<128x512xbf16>, vector<16x512xf32> -> vector<16x512xf32>
    %67 = arith.addf %64, %66 : vector<16x512xf32>
    %68 = vector.extract_strided_slice %67 {offsets = [0, 0], sizes = [16, 384], strides = [1, 1]} : vector<16x512xf32> to vector<16x384xf32>
    %69 = arith.negf %68 : vector<16x384xf32>
    %70 = math.exp %69 : vector<16x384xf32>
    %cst_26 = arith.constant 1.000000e+00 : f32
    %71 = vector.broadcast %cst_26 : f32 to vector<16x384xf32>
    %72 = arith.addf %71, %70 : vector<16x384xf32>
    %73 = arith.divf %71, %72 : vector<16x384xf32>
    %74 = vector.extract_strided_slice %67 {offsets = [0, 384], sizes = [16, 128], strides = [1, 1]} : vector<16x512xf32> to vector<16x128xf32>
    %75 = math.tanh %74 : vector<16x128xf32>
    %76 = vector.extract_strided_slice %73 {offsets = [0, 0], sizes = [16, 128], strides = [1, 1]} : vector<16x384xf32> to vector<16x128xf32>
    %77 = vector.extract_strided_slice %73 {offsets = [0, 128], sizes = [16, 128], strides = [1, 1]} : vector<16x384xf32> to vector<16x128xf32>
    %78 = vector.extract_strided_slice %73 {offsets = [0, 256], sizes = [16, 128], strides = [1, 1]} : vector<16x384xf32> to vector<16x128xf32>
    %79 = arith.mulf %77, %58 : vector<16x128xf32>
    %80 = arith.mulf %76, %75 : vector<16x128xf32>
    %81 = arith.addf %79, %80 : vector<16x128xf32>
    %82 = math.tanh %81 : vector<16x128xf32>
    %83 = arith.mulf %78, %82 : vector<16x128xf32>
    %c3_i32 = arith.constant 3 : i32
    %c16_i32_27 = arith.constant 16 : i32
    %84 = arith.muli %c3_i32, %c16_i32_27 : i32
    %85 = tpu.assume_multiple %84, 16 : i32
    %86 = arith.index_cast %85 : i32 to index
    %c0_28 = arith.constant 0 : index
    %87 = vector.load %arg11[%86, %c0_28] : memref<128x512xf32, #tpu.memory_space<vmem>>, vector<16x512xf32>
    %88 = arith.truncf %83 : vector<16x128xf32> to vector<16x128xbf16>
    %cst_29 = arith.constant dense<0.000000e+00> : vector<16x512xf32>
    %89 = tpu.matmul %88, %12, %cst_29 {dimension_numbers = #tpu.dot_dimension_numbers<[1], [0], [0], [1], [0, 0, 1, 1], [], []>} : vector<16x128xbf16>, vector<128x512xbf16>, vector<16x512xf32> -> vector<16x512xf32>
    %90 = arith.addf %87, %89 : vector<16x512xf32>
    %91 = vector.extract_strided_slice %90 {offsets = [0, 0], sizes = [16, 384], strides = [1, 1]} : vector<16x512xf32> to vector<16x384xf32>
    %92 = arith.negf %91 : vector<16x384xf32>
    %93 = math.exp %92 : vector<16x384xf32>
    %cst_30 = arith.constant 1.000000e+00 : f32
    %94 = vector.broadcast %cst_30 : f32 to vector<16x384xf32>
    %95 = arith.addf %94, %93 : vector<16x384xf32>
    %96 = arith.divf %94, %95 : vector<16x384xf32>
    %97 = vector.extract_strided_slice %90 {offsets = [0, 384], sizes = [16, 128], strides = [1, 1]} : vector<16x512xf32> to vector<16x128xf32>
    %98 = math.tanh %97 : vector<16x128xf32>
    %99 = vector.extract_strided_slice %96 {offsets = [0, 0], sizes = [16, 128], strides = [1, 1]} : vector<16x384xf32> to vector<16x128xf32>
    %100 = vector.extract_strided_slice %96 {offsets = [0, 128], sizes = [16, 128], strides = [1, 1]} : vector<16x384xf32> to vector<16x128xf32>
    %101 = vector.extract_strided_slice %96 {offsets = [0, 256], sizes = [16, 128], strides = [1, 1]} : vector<16x384xf32> to vector<16x128xf32>
    %102 = arith.mulf %100, %81 : vector<16x128xf32>
    %103 = arith.mulf %99, %98 : vector<16x128xf32>
    %104 = arith.addf %102, %103 : vector<16x128xf32>
    %105 = math.tanh %104 : vector<16x128xf32>
    %106 = arith.mulf %101, %105 : vector<16x128xf32>
    %c4_i32 = arith.constant 4 : i32
    %c16_i32_31 = arith.constant 16 : i32
    %107 = arith.muli %c4_i32, %c16_i32_31 : i32
    %108 = tpu.assume_multiple %107, 16 : i32
    %109 = arith.index_cast %108 : i32 to index
    %c0_32 = arith.constant 0 : index
    %110 = vector.load %arg11[%109, %c0_32] : memref<128x512xf32, #tpu.memory_space<vmem>>, vector<16x512xf32>
    %111 = arith.truncf %106 : vector<16x128xf32> to vector<16x128xbf16>
    %cst_33 = arith.constant dense<0.000000e+00> : vector<16x512xf32>
    %112 = tpu.matmul %111, %12, %cst_33 {dimension_numbers = #tpu.dot_dimension_numbers<[1], [0], [0], [1], [0, 0, 1, 1], [], []>} : vector<16x128xbf16>, vector<128x512xbf16>, vector<16x512xf32> -> vector<16x512xf32>
    %113 = arith.addf %110, %112 : vector<16x512xf32>
    %114 = vector.extract_strided_slice %113 {offsets = [0, 0], sizes = [16, 384], strides = [1, 1]} : vector<16x512xf32> to vector<16x384xf32>
    %115 = arith.negf %114 : vector<16x384xf32>
    %116 = math.exp %115 : vector<16x384xf32>
    %cst_34 = arith.constant 1.000000e+00 : f32
    %117 = vector.broadcast %cst_34 : f32 to vector<16x384xf32>
    %118 = arith.addf %117, %116 : vector<16x384xf32>
    %119 = arith.divf %117, %118 : vector<16x384xf32>
    %120 = vector.extract_strided_slice %113 {offsets = [0, 384], sizes = [16, 128], strides = [1, 1]} : vector<16x512xf32> to vector<16x128xf32>
    %121 = math.tanh %120 : vector<16x128xf32>
    %122 = vector.extract_strided_slice %119 {offsets = [0, 0], sizes = [16, 128], strides = [1, 1]} : vector<16x384xf32> to vector<16x128xf32>
    %123 = vector.extract_strided_slice %119 {offsets = [0, 128], sizes = [16, 128], strides = [1, 1]} : vector<16x384xf32> to vector<16x128xf32>
    %124 = vector.extract_strided_slice %119 {offsets = [0, 256], sizes = [16, 128], strides = [1, 1]} : vector<16x384xf32> to vector<16x128xf32>
    %125 = arith.mulf %123, %104 : vector<16x128xf32>
    %126 = arith.mulf %122, %121 : vector<16x128xf32>
    %127 = arith.addf %125, %126 : vector<16x128xf32>
    %128 = math.tanh %127 : vector<16x128xf32>
    %129 = arith.mulf %124, %128 : vector<16x128xf32>
    %c5_i32 = arith.constant 5 : i32
    %c16_i32_35 = arith.constant 16 : i32
    %130 = arith.muli %c5_i32, %c16_i32_35 : i32
    %131 = tpu.assume_multiple %130, 16 : i32
    %132 = arith.index_cast %131 : i32 to index
    %c0_36 = arith.constant 0 : index
    %133 = vector.load %arg11[%132, %c0_36] : memref<128x512xf32, #tpu.memory_space<vmem>>, vector<16x512xf32>
    %134 = arith.truncf %129 : vector<16x128xf32> to vector<16x128xbf16>
    %cst_37 = arith.constant dense<0.000000e+00> : vector<16x512xf32>
    %135 = tpu.matmul %134, %12, %cst_37 {dimension_numbers = #tpu.dot_dimension_numbers<[1], [0], [0], [1], [0, 0, 1, 1], [], []>} : vector<16x128xbf16>, vector<128x512xbf16>, vector<16x512xf32> -> vector<16x512xf32>
    %136 = arith.addf %133, %135 : vector<16x512xf32>
    %137 = vector.extract_strided_slice %136 {offsets = [0, 0], sizes = [16, 384], strides = [1, 1]} : vector<16x512xf32> to vector<16x384xf32>
    %138 = arith.negf %137 : vector<16x384xf32>
    %139 = math.exp %138 : vector<16x384xf32>
    %cst_38 = arith.constant 1.000000e+00 : f32
    %140 = vector.broadcast %cst_38 : f32 to vector<16x384xf32>
    %141 = arith.addf %140, %139 : vector<16x384xf32>
    %142 = arith.divf %140, %141 : vector<16x384xf32>
    %143 = vector.extract_strided_slice %136 {offsets = [0, 384], sizes = [16, 128], strides = [1, 1]} : vector<16x512xf32> to vector<16x128xf32>
    %144 = math.tanh %143 : vector<16x128xf32>
    %145 = vector.extract_strided_slice %142 {offsets = [0, 0], sizes = [16, 128], strides = [1, 1]} : vector<16x384xf32> to vector<16x128xf32>
    %146 = vector.extract_strided_slice %142 {offsets = [0, 128], sizes = [16, 128], strides = [1, 1]} : vector<16x384xf32> to vector<16x128xf32>
    %147 = vector.extract_strided_slice %142 {offsets = [0, 256], sizes = [16, 128], strides = [1, 1]} : vector<16x384xf32> to vector<16x128xf32>
    %148 = arith.mulf %146, %127 : vector<16x128xf32>
    %149 = arith.mulf %145, %144 : vector<16x128xf32>
    %150 = arith.addf %148, %149 : vector<16x128xf32>
    %151 = math.tanh %150 : vector<16x128xf32>
    %152 = arith.mulf %147, %151 : vector<16x128xf32>
    %c6_i32 = arith.constant 6 : i32
    %c16_i32_39 = arith.constant 16 : i32
    %153 = arith.muli %c6_i32, %c16_i32_39 : i32
    %154 = tpu.assume_multiple %153, 16 : i32
    %155 = arith.index_cast %154 : i32 to index
    %c0_40 = arith.constant 0 : index
    %156 = vector.load %arg11[%155, %c0_40] : memref<128x512xf32, #tpu.memory_space<vmem>>, vector<16x512xf32>
    %157 = arith.truncf %152 : vector<16x128xf32> to vector<16x128xbf16>
    %cst_41 = arith.constant dense<0.000000e+00> : vector<16x512xf32>
    %158 = tpu.matmul %157, %12, %cst_41 {dimension_numbers = #tpu.dot_dimension_numbers<[1], [0], [0], [1], [0, 0, 1, 1], [], []>} : vector<16x128xbf16>, vector<128x512xbf16>, vector<16x512xf32> -> vector<16x512xf32>
    %159 = arith.addf %156, %158 : vector<16x512xf32>
    %160 = vector.extract_strided_slice %159 {offsets = [0, 0], sizes = [16, 384], strides = [1, 1]} : vector<16x512xf32> to vector<16x384xf32>
    %161 = arith.negf %160 : vector<16x384xf32>
    %162 = math.exp %161 : vector<16x384xf32>
    %cst_42 = arith.constant 1.000000e+00 : f32
    %163 = vector.broadcast %cst_42 : f32 to vector<16x384xf32>
    %164 = arith.addf %163, %162 : vector<16x384xf32>
    %165 = arith.divf %163, %164 : vector<16x384xf32>
    %166 = vector.extract_strided_slice %159 {offsets = [0, 384], sizes = [16, 128], strides = [1, 1]} : vector<16x512xf32> to vector<16x128xf32>
    %167 = math.tanh %166 : vector<16x128xf32>
    %168 = vector.extract_strided_slice %165 {offsets = [0, 0], sizes = [16, 128], strides = [1, 1]} : vector<16x384xf32> to vector<16x128xf32>
    %169 = vector.extract_strided_slice %165 {offsets = [0, 128], sizes = [16, 128], strides = [1, 1]} : vector<16x384xf32> to vector<16x128xf32>
    %170 = vector.extract_strided_slice %165 {offsets = [0, 256], sizes = [16, 128], strides = [1, 1]} : vector<16x384xf32> to vector<16x128xf32>
    %171 = arith.mulf %169, %150 : vector<16x128xf32>
    %172 = arith.mulf %168, %167 : vector<16x128xf32>
    %173 = arith.addf %171, %172 : vector<16x128xf32>
    %174 = math.tanh %173 : vector<16x128xf32>
    %175 = arith.mulf %170, %174 : vector<16x128xf32>
    %c7_i32 = arith.constant 7 : i32
    %c16_i32_43 = arith.constant 16 : i32
    %176 = arith.muli %c7_i32, %c16_i32_43 : i32
    %177 = tpu.assume_multiple %176, 16 : i32
    %178 = arith.index_cast %177 : i32 to index
    %c0_44 = arith.constant 0 : index
    %179 = vector.load %arg11[%178, %c0_44] : memref<128x512xf32, #tpu.memory_space<vmem>>, vector<16x512xf32>
    %180 = arith.truncf %175 : vector<16x128xf32> to vector<16x128xbf16>
    %cst_45 = arith.constant dense<0.000000e+00> : vector<16x512xf32>
    %181 = tpu.matmul %180, %12, %cst_45 {dimension_numbers = #tpu.dot_dimension_numbers<[1], [0], [0], [1], [0, 0, 1, 1], [], []>} : vector<16x128xbf16>, vector<128x512xbf16>, vector<16x512xf32> -> vector<16x512xf32>
    %182 = arith.addf %179, %181 : vector<16x512xf32>
    %183 = vector.extract_strided_slice %182 {offsets = [0, 0], sizes = [16, 384], strides = [1, 1]} : vector<16x512xf32> to vector<16x384xf32>
    %184 = arith.negf %183 : vector<16x384xf32>
    %185 = math.exp %184 : vector<16x384xf32>
    %cst_46 = arith.constant 1.000000e+00 : f32
    %186 = vector.broadcast %cst_46 : f32 to vector<16x384xf32>
    %187 = arith.addf %186, %185 : vector<16x384xf32>
    %188 = arith.divf %186, %187 : vector<16x384xf32>
    %189 = vector.extract_strided_slice %182 {offsets = [0, 384], sizes = [16, 128], strides = [1, 1]} : vector<16x512xf32> to vector<16x128xf32>
    %190 = math.tanh %189 : vector<16x128xf32>
    %191 = vector.extract_strided_slice %188 {offsets = [0, 0], sizes = [16, 128], strides = [1, 1]} : vector<16x384xf32> to vector<16x128xf32>
    %192 = vector.extract_strided_slice %188 {offsets = [0, 128], sizes = [16, 128], strides = [1, 1]} : vector<16x384xf32> to vector<16x128xf32>
    %193 = vector.extract_strided_slice %188 {offsets = [0, 256], sizes = [16, 128], strides = [1, 1]} : vector<16x384xf32> to vector<16x128xf32>
    %194 = arith.mulf %192, %173 : vector<16x128xf32>
    %195 = arith.mulf %191, %190 : vector<16x128xf32>
    %196 = arith.addf %194, %195 : vector<16x128xf32>
    %197 = math.tanh %196 : vector<16x128xf32>
    %198 = arith.mulf %193, %197 : vector<16x128xf32>
    %c8_i32 = arith.constant 8 : i32
    %c0_47 = arith.constant 0 : index
    %c0_48 = arith.constant 0 : index
    %199 = vector.load %arg9[%c0_47, %c0_48] : memref<16x128xf32, #tpu.memory_space<vmem>>, vector<16x128xf32>
    tpu.vector_store %arg9[%c0_47, %c0_48], %198 {strides = array<i32>} : memref<16x128xf32, #tpu.memory_space<vmem>>, vector<16x128xf32>,
    %c0_49 = arith.constant 0 : index
    %c0_50 = arith.constant 0 : index
    %200 = vector.load %arg10[%c0_49, %c0_50] : memref<16x128xf32, #tpu.memory_space<vmem>>, vector<16x128xf32>
    tpu.vector_store %arg10[%c0_49, %c0_50], %196 {strides = array<i32>} : memref<16x128xf32, #tpu.memory_space<vmem>>, vector<16x128xf32>,
    %c0_i32_51 = arith.constant 0 : i32
    %201 = arith.cmpi eq, %arg1, %c0_i32_51 : i32
    %202 = arith.extui %201 : i1 to i32
    %c0_i32_52 = arith.constant 0 : i32
    %203 = arith.cmpi ne, %202, %c0_i32_52 : i32
    scf.if %203 {
      %204 = arith.truncf %198 : vector<16x128xf32> to vector<16x128xbf16>
      %c0_53 = arith.constant 0 : index
      %c0_54 = arith.constant 0 : index
      %205 = vector.load %arg6[%c0_53, %c0_54] : memref<128x128xbf16, #tpu.memory_space<vmem>>, vector<128x128xbf16>
      %cst_55 = arith.constant dense<0.000000e+00> : vector<16x128xf32>
      %206 = tpu.matmul %204, %205, %cst_55 {dimension_numbers = #tpu.dot_dimension_numbers<[1], [0], [0], [1], [0, 0, 1, 1], [], []>} : vector<16x128xbf16>, vector<128x128xbf16>, vector<16x128xf32> -> vector<16x128xf32>
      %c0_56 = arith.constant 0 : index
      %c0_57 = arith.constant 0 : index
      %207 = vector.load %arg7[%c0_56, %c0_57] : memref<1x128xf32, #tpu.memory_space<vmem>>, vector<1x128xf32>
      %208 = vector.broadcast %207 : vector<1x128xf32> to vector<16x128xf32>
      %209 = arith.addf %206, %208 : vector<16x128xf32>
      %c0_58 = arith.constant 0 : index
      %c0_59 = arith.constant 0 : index
      %210 = vector.load %arg8[%c0_58, %c0_59] : memref<16x128xf32, #tpu.memory_space<vmem>>, vector<16x128xf32>
      tpu.vector_store %arg8[%c0_58, %c0_59], %209 {strides = array<i32>} : memref<16x128xf32, #tpu.memory_space<vmem>>, vector<16x128xf32>,
    } else {
    }
    return
  }
  func.func @transform_0(%arg0: i32, %arg1: i32) -> (i32, i32, i32) {
    %c0_i32 = arith.constant 0 : i32
    %c0_i32_0 = arith.constant 0 : i32
    return %arg1, %arg0, %c0_i32 : i32, i32, i32
  }
  func.func @transform_1(%arg0: i32, %arg1: i32) -> (i32, i32) {
    %c0_i32 = arith.constant 0 : i32
    %c0_i32_0 = arith.constant 0 : i32
    %c0_i32_1 = arith.constant 0 : i32
    return %c0_i32, %c0_i32_0 : i32, i32
  }
  func.func @transform_2(%arg0: i32, %arg1: i32) -> (i32, i32) {
    %c0_i32 = arith.constant 0 : i32
    %c0_i32_0 = arith.constant 0 : i32
    %c0_i32_1 = arith.constant 0 : i32
    return %c0_i32, %c0_i32_0 : i32, i32
  }
  func.func @transform_3(%arg0: i32, %arg1: i32) -> (i32, i32) {
    %c0_i32 = arith.constant 0 : i32
    %c0_i32_0 = arith.constant 0 : i32
    %c0_i32_1 = arith.constant 0 : i32
    return %c0_i32, %c0_i32_0 : i32, i32
  }
  func.func @transform_4(%arg0: i32, %arg1: i32) -> (i32, i32) {
    %c0_i32 = arith.constant 0 : i32
    %c0_i32_0 = arith.constant 0 : i32
    %c0_i32_1 = arith.constant 0 : i32
    return %c0_i32, %c0_i32_0 : i32, i32
  }
  func.func @transform_5(%arg0: i32, %arg1: i32) -> (i32, i32) {
    %c0_i32 = arith.constant 0 : i32
    %c0_i32_0 = arith.constant 0 : i32
    %c0_i32_1 = arith.constant 0 : i32
    return %c0_i32, %c0_i32_0 : i32, i32
  }
  func.func @transform_6(%arg0: i32, %arg1: i32) -> (i32, i32) {
    %c0_i32 = arith.constant 0 : i32
    %c0_i32_0 = arith.constant 0 : i32
    return %arg0, %c0_i32 : i32, i32
  }
}

</mosaic_0001>

<bundles_post_ra>
// kernel: tpu_custom_call.1
= control target key start
LH: loop header
LB: loop body
LE: loop exit
PB: predicated region body
PF: predicated region fallthrough
CT: control target
= control target key end

     0   :  { %11 = vsyncpa [#allocation6], 0  ;;  %s3584_s0 = inlined_call_operand.hbm [shape: f32[8,16,26], index: 0, kind: input, shape index: {}]   ;;  %s3585_s1 = inlined_call_operand.hbm [shape: bf16[26,512], index: 1, kind: input, shape index: {}]   ;;  %s3586_s2 = inlined_call_operand.hbm [shape: f32[1,512], index: 2, kind: input, shape index: {}]   ;;  %s3587_s3 = inlined_call_operand.hbm [shape: bf16[128,512], index: 3, kind: input, shape index: {}]   ;;  %s3588_s4 = inlined_call_operand.hbm [shape: bf16[128,128], index: 4, kind: input, shape index: {}]   ;;  %s3589_s5 = inlined_call_operand.vmem [shape: f32[1,128], index: 5, kind: input, shape index: {}]   ;;  %s3590_s6 = inlined_call_operand.hbm [shape: f32[16,128], index: 6, kind: output, shape index: {}]  }
   0x1   :  { %12 = vsyncpa [#allocation9], 0 }
   0x2   :  { %13 = vsyncpa [#allocation12], 0 }
   0x3   :  { %14 = vsyncpa [#allocation7], 0  ;;  %s2741_s21 = smov [#allocation8]  }
   0x4   :  { %s32_s22 = sshll.u32 %s2741_s21, 4  ;;  %s33_s22 = int_to_ptr.vmem [resolvable:$true] %s32_s22 }
   0x5   :  { %s2621_s23 = scalar_lea.vmem %s33_s22, 1024  ;;  %p2626_p1 = scmp.lt.s32.totalorder %s33_s22, %s33_s22 }
   0x6   :  { %p2622_p0 = scmp.ne.s32.totalorder %s33_s22, %s2621_s23  ;;  %p2627_p2 = scmp.lt.s32.totalorder %s2621_s23, %s2621_s23 }
   0x8   :  { %p2628_p3 = por %p2627_p2, %p2626_p1 }
   0xa   :  { %p2629_p4 = pnand %p2628_p3, %p2622_p0 }
   0xc   :  { %2632 = shalt.err (!%p2629_p4)
}
   0xd   :  { %s2742_s24 = smov 256   ;;  %s2743_s25 = smov 16  }
   0xe   :  { %38 = dma.hbm_to_vmem [thread:$0]  %s3585_s1, 1024, %s33_s22, [#allocation9], %s2742_s24, %s2742_s24, %s2743_s25  }
   0xf   :  { %s2744_s28 = smov [#allocation11]   ;;  %s2745_s30 = smov [#allocation5]  }
  0x10   :  { %s54_s29 = sshll.u32 %s2744_s28, 4  ;;  %s20_s7 = sshll.u32 %s2745_s30, 4  ;;  %s55_s29 = int_to_ptr.vmem [resolvable:$true] %s54_s29  ;;  %s21_s7 = int_to_ptr.vmem [resolvable:$true] %s20_s7 }
  0x11   :  { %s2641_s8 = scalar_lea.vmem %s55_s29, 4096  ;;  %p2646_p6 = scmp.lt.s32.totalorder %s55_s29, %s55_s29 }
  0x12   :  { %p2642_p5 = scmp.ne.s32.totalorder %s55_s29, %s2641_s8  ;;  %p2647_p7 = scmp.lt.s32.totalorder %s2641_s8, %s2641_s8 }
  0x14   :  { %p2648_p8 = por %p2647_p7, %p2646_p6 }
  0x16   :  { %p2649_p9 = pnand %p2648_p8, %p2642_p5 }
  0x18   :  { %2652 = shalt.err (!%p2649_p9)
}
  0x19   :  { %60 = dma.hbm_to_vmem [thread:$0]  %s3587_s3, 4096, %s55_s29, [#allocation12], %s2742_s24, %s2742_s24, %s2743_s25  }
  0x1a   :  { %s2661_s11 = scalar_lea.vmem %s21_s7, 2048  ;;  %p2666_p11 = scmp.lt.s32.totalorder %s21_s7, %s21_s7 }
  0x1b   :  { %p2662_p10 = scmp.ne.s32.totalorder %s21_s7, %s2661_s11  ;;  %p2667_p12 = scmp.lt.s32.totalorder %s2661_s11, %s2661_s11 }
  0x1d   :  { %p2668_p13 = por %p2667_p12, %p2666_p11 }
  0x1f   :  { %p2669_p0 = pnand %p2668_p13, %p2662_p10 }
  0x21   :  { %2672 = shalt.err (!%p2669_p0)
}
  0x22   :  { %s2746_s1 = smov 128   ;;  %s2747_s12 = smov 8  }
  0x23   :  { %26 = dma.hbm_to_vmem [thread:$0]  %s3584_s0, 2048, %s21_s7, [#allocation6], %s2746_s1, %s2746_s1, %s2747_s12  }
  0x24   :  { %s2748_s15 = smov [#allocation10]   ;;  %s2749_s3 = smov [#allocation13]  }
  0x25   :  { %s45_s16 = sshll.u32 %s2748_s15, 4  ;;  %s66_s17 = sshll.u32 %s2749_s3, 4  ;;  %s46_s16 = int_to_ptr.vmem [resolvable:$true] %s45_s16  ;;  %s67_s17 = int_to_ptr.vmem [resolvable:$true] %s66_s17 }
  0x26   :  { %s2681_s18 = scalar_lea.vmem %s46_s16, 64  ;;  %p2686_p2 = scmp.lt.s32.totalorder %s46_s16, %s46_s16 }
  0x27   :  { %p2682_p1 = scmp.ne.s32.totalorder %s46_s16, %s2681_s18  ;;  %p2687_p3 = scmp.lt.s32.totalorder %s2681_s18, %s2681_s18 }
  0x29   :  { %p2688_p4 = por %p2687_p3, %p2686_p2 }
  0x2b   :  { %p2689_p5 = pnand %p2688_p4, %p2682_p1 }
  0x2d   :  { %2692 = shalt.err (!%p2689_p5)
}
  0x2e   :  { %48 = dma.hbm_to_vmem [thread:$0]  %s3586_s2, 64, %s46_s16, [#allocation9]  }
  0x2f   :  { %s2701_s21 = scalar_lea.vmem %s67_s17, 1024  ;;  %p2706_p7 = scmp.lt.s32.totalorder %s67_s17, %s67_s17 }
  0x30   :  { %p2702_p6 = scmp.ne.s32.totalorder %s67_s17, %s2701_s21  ;;  %p2707_p8 = scmp.lt.s32.totalorder %s2701_s21, %s2701_s21 }
  0x32   :  { %p2708_p9 = por %p2707_p8, %p2706_p7 }
  0x34   :  { %p2709_p10 = pnand %p2708_p9, %p2702_p6 }
  0x36   :  { %2712 = shalt.err (!%p2709_p10)
}
  0x37   :  { %s2750_s0 = smov 64   ;;  %s2751_s22 = smov 4  }
  0x38   :  { %72 = dma.hbm_to_vmem [thread:$0]  %s3588_s4, 1024, %s67_s17, [#allocation12], %s2750_s0, %s2750_s0, %s2751_s22  }
  0x39   :  { %2733 = dma.done.wait [#allocation6], 2048  }
  0x3a   :  { %2734 = vsyncadd [#allocation6], 4294965248 }
  0x3b   :  { %2735 = dma.done.wait [#allocation9], 1088  }
  0x3c   :  { %2736 = vsyncadd [#allocation9], 4294966208 }
  0x3d   :  { %2737 = dma.done.wait [#allocation12], 5120  }
  0x3e   :  { %2738 = vsyncadd [#allocation12], 4294962176  ;;  %v3591_v0 = vmov 0   ;;  %vm214_vm0 = vcmask 1044480   ;;  %v2260_v3 = vld [vmem:[#allocation8 + $0x4] ss:$16 sps:$4 sm:$0xff]  }
  0x3f   :  { %259 = vmatprep.mubr.bf16.mxu0 %v3591_v0  ;;  %319 = vmatprep.mubr.bf16.mxu1 %v3591_v0  ;;  %v2257_v1 = vld [vmem:[#allocation8 + $0x24] ss:$16 sps:$4 sm:$0x1f]   ;;  %v2259_v2 = vld [vmem:[#allocation8 + $0x20] ss:$16 sps:$4 sm:$0x1f]  }
  0x40   :  { %2101 = vmatprep.subr.msk.bf16.mxu0 %vm214_vm0, %v2257_v1  ;;  %2237 = vmatprep.subr.msk.bf16.mxu1 %vm214_vm0, %v2257_v1  ;;  %v2262_v4 = vld [vmem:[#allocation8] ss:$16 sps:$4 sm:$0xff]   ;;  %v216_v5 = vsel %vm214_vm0, %v2259_v2, 0  ;;  %v109_v7 = vld [vmem:[#allocation5 + $0x8] sm:$0xff]  ;;  %vm189_vm1 = vcmask 211968   ;;  %v111_v18 = vld [vmem:[#allocation5 + $0x18] sm:$0xff] }
  0x41   :  { %v108_v6 = vld [vmem:[#allocation5] sm:$0xff]  ;;  %240 = vmatpush1.bf16.msra.mxu0 %v216_v5  ;;  %2239 = vmatpush1.bf16.msra.mxu1 %v216_v5  ;;  %v121_v9 = vld [vmem:[#allocation5 + $0x68] sm:$0xff]  ;;  %v110_v17 = vld [vmem:[#allocation5 + $0x10] sm:$0xff]  ;;  %v133_v5 = vlaneseq  ;;  %vm2755_vm2 = vmmov 0   ;;  %s2756_s25 = smov [#allocation14]  }
  0x42   :  { %v120_v8 = vld [vmem:[#allocation5 + $0x60] sm:$0xff]  ;;  %241 = vmatprep.subr.bf16.mxu0 %v2260_v3  ;;  %2238 = vmatprep.subr.bf16.mxu1 %v2260_v3  ;;  %v2263_v10 = vld [vmem:[#allocation8 + $0x2c] ss:$16 sps:$4 sm:$0x1f]   ;;  %v124_v12 = vpack.c.bf16 %v109_v7, %v108_v6  ;;  %v2817_v14 = vld [vmem:[#allocation11 + $0xe4] ss:$16 sps:$4 sm:$0xff]   ;;  %v125_v26 = vpack.c.bf16 %v111_v18, %v110_v17 }
  0x43   :  { %v2265_v11 = vld [vmem:[#allocation8 + $0x28] ss:$16 sps:$4 sm:$0x1f]   ;;  %v2815_v13 = vpack.c.bf16 %v121_v9, %v120_v8  ;;  %v2268_v16 = vld [vmem:[#allocation8 + $0xc] ss:$16 sps:$4 sm:$0xff]   ;;  %v122_v20 = vld [vmem:[#allocation5 + $0x70] sm:$0xff] }
  0x44   :  { %v222_v15 = vsel %vm214_vm0, %v2265_v11, 0  ;;  %v2822_v19 = vld [vmem:[#allocation11 + $0xe0] ss:$16 sps:$4 sm:$0xff]   ;;  %v123_v21 = vld [vmem:[#allocation5 + $0x78] sm:$0xff]  ;;  %v2831_v24 = vld [vmem:[#allocation11 + $0xec] ss:$16 sps:$4 sm:$0xff]  }
  0x45   :  { %242 = vmatpush1.bf16.msra.mxu0 %v2262_v4  ;;  %2240 = vmatpush1.bf16.msra.mxu1 %v2262_v4  ;;  %v2266_v22 = vld [vmem:[#allocation8 + $0x8] ss:$16 sps:$4 sm:$0xff]   ;;  %v2834_v25 = vld [vmem:[#allocation11 + $0xc0] ss:$16 sps:$4 sm:$0xff]   ;;  %v2836_v27 = vpack.c.bf16 %v123_v21, %v122_v20  ;;  %v2857_v35 = vld [vmem:[#allocation11 + $0xe8] ss:$16 sps:$4 sm:$0xff]  }
  0x46   :  { %2110 = vmatprep.subr.msk.bf16.mxu1 %vm214_vm0, %v2263_v10  ;;  %725 = vmatprep.subr.bf16.mxu0 %v2817_v14  ;;  %v2828_v23 = vld [vmem:[#allocation11 + $0xc4] ss:$16 sps:$4 sm:$0xff]   ;;  %v2843_v29 = vld [vmem:[#allocation11 + $0xa0] ss:$16 sps:$4 sm:$0xff]   ;;  %v2859_v36 = vld [vmem:[#allocation11 + $0xcc] ss:$16 sps:$4 sm:$0xff]  }
  0x47   :  { %v2840_v28 = vld [vmem:[#allocation11 + $0xa4] ss:$16 sps:$4 sm:$0xff]   ;;  %v112_v31 = vld [vmem:[#allocation5 + $0x20] sm:$0xff]  ;;  %v114_v37 = vld [vmem:[#allocation5 + $0x30] sm:$0xff]  ;;  %v2753_v4 = vmov 0.0|0.0   ;;  %v134_v6 = vshrl.u32 %v133_v5, 7 }
  0x48   :  { %2102 = vmatmul.mubr.msk.bf16.vlgmr.msra.gmra.mxu0 %vm189_vm1, %v124_v12  ;;  %2108 = vmatmul.mubr.msk.bf16.vlgmr.msra.gmra.mxu1 %vm189_vm1, %v2815_v13  ;;  %v2848_v30 = vld [vmem:[#allocation11 + $0x84] ss:$16 sps:$4 sm:$0xff]   ;;  %v2854_v33 = vld [vmem:[#allocation11 + $0x80] ss:$16 sps:$4 sm:$0xff]   ;;  %v2866_v40 = vld [vmem:[#allocation11 + $0xc8] ss:$16 sps:$4 sm:$0xff]  }
  0x49   :  { %353 = vmatpush1.bf16.msra.mxu1 %v222_v15  ;;  %269 = vmatprep.mubr.bf16.mxu0 %v3591_v0  ;;  %v113_v32 = vld [vmem:[#allocation5 + $0x28] sm:$0xff]  ;;  %v115_v38 = vld [vmem:[#allocation5 + $0x38] sm:$0xff]  ;;  %v2868_v41 = vld [vmem:[#allocation11 + $0x60] ss:$16 sps:$4 sm:$0xff]   ;;  %v135_v7 = vsub.s32 0, %v134_v6  ;;  %v139_v9 = vsub.s32 1, %v134_v6 }
  0x4a   :  { %329 = vmatprep.mubr.bf16.mxu1 %v3591_v0  ;;  %354 = vmatprep.subr.bf16.mxu1 %v2268_v16  ;;  %v126_v34 = vpack.c.bf16 %v113_v32, %v112_v31  ;;  %v2862_v39 = vld [vmem:[#allocation11 + $0x64] ss:$16 sps:$4 sm:$0xff]   ;;  %v2876_v43 = vld [vmem:[#allocation11 + $0xac] ss:$16 sps:$4 sm:$0xff]   ;;  %v127_v44 = vpack.c.bf16 %v115_v38, %v114_v37  ;;  %v2880_v45 = vld [vmem:[#allocation11 + $0xa8] ss:$16 sps:$4 sm:$0xff]  }
  0x4b   :  { %726 = vmatpush1.bf16.msra.mxu0 %v2822_v19  ;;  %v2872_v42 = vld [vmem:[#allocation11 + $0x44] ss:$16 sps:$4 sm:$0xff]   ;;  %v2882_v46 = vld [vmem:[#allocation11 + $0x40] ss:$16 sps:$4 sm:$0xff]   ;;  %v2888_v48 = vld [vmem:[#allocation11 + $0x8c] ss:$16 sps:$4 sm:$0xff]  }
  0x4c   :  { %727 = vmatprep.subr.bf16.mxu0 %v2828_v23  ;;  %v2886_v47 = vld [vmem:[#allocation11 + $0x24] ss:$16 sps:$4 sm:$0xff]   ;;  %v116_v49 = vld [vmem:[#allocation5 + $0x40] sm:$0xff]  ;;  %v2899_v52 = vld [vmem:[#allocation11 + $0x88] ss:$16 sps:$4 sm:$0xff]   ;;  %s2072_s26 = sshll.u32 %s2756_s25, 4  ;;  %s2073_s26 = int_to_ptr.vmem [resolvable:$true] %s2072_s26 }
  0x4d   :  { %355 = vmatpush1.bf16.msra.mxu1 %v2266_v22  ;;  %v117_v50 = vld [vmem:[#allocation5 + $0x48] sm:$0xff]  ;;  %v2893_v51 = vld [vmem:[#allocation11 + $0x20] ss:$16 sps:$4 sm:$0xff]   ;;  %v2905_v54 = vld [vmem:[#allocation11 + $0x6c] ss:$16 sps:$4 sm:$0xff]   ;;  %s2713_s27 = scalar_lea.vmem %s2073_s26, 256  ;;  %p2718_p12 = scmp.lt.s32.totalorder %s2073_s26, %s2073_s26 }
  0x4e   :  { %768 = vmatprep.subr.bf16.mxu1 %v2831_v24  ;;  %v2903_v53 = vld [vmem:[#allocation11 + $0x4] ss:$16 sps:$4 sm:$0xff]   ;;  %v128_v55 = vpack.c.bf16 %v117_v50, %v116_v49  ;;  %v2909_v56 = vld [vmem:[#allocation11] ss:$16 sps:$4 sm:$0xff]   ;;  %v2911_v57 = vld [vmem:[#allocation11 + $0x68] ss:$16 sps:$4 sm:$0xff]   ;;  %p2714_p11 = scmp.ne.s32.totalorder %s2073_s26, %s2713_s27  ;;  %p2719_p13 = scmp.lt.s32.totalorder %s2713_s27, %s2713_s27 }
  0x4f   :  { %728 = vmatpush1.bf16.msra.mxu0 %v2834_v25  ;;  %v2915_v58 = vld [vmem:[#allocation11 + $0x4c] ss:$16 sps:$4 sm:$0xff]   ;;  %v119_v60 = vld [vmem:[#allocation5 + $0x58] sm:$0xff] }
  0x50   :  { %2103 = vmatmul.mubr.msk.bf16.gmra.mxu0 %vm189_vm1, %v125_v26  ;;  %2109 = vmatmul.mubr.msk.bf16.gmra.mxu1 %vm189_vm1, %v2836_v27  ;;  %v118_v59 = vld [vmem:[#allocation5 + $0x50] sm:$0xff]  ;;  %v2923_v61 = vld [vmem:[#allocation11 + $0x48] ss:$16 sps:$4 sm:$0xff]   ;;  %v107_v8 = vld [vmem:[#allocation10] sm:$0xf]  ;;  %p2720_p0 = por %p2719_p13, %p2718_p12 }
  0x51   :  { %279 = vmatprep.mubr.bf16.mxu0 %v3591_v0  ;;  %372 = vmatprep.mubr.bf16.mxu1 %v3591_v0  ;;  %v2926_v62 = vld [vmem:[#allocation11 + $0x2c] ss:$16 sps:$4 sm:$0xff]   ;;  %v129_v63 = vpack.c.bf16 %v119_v60, %v118_v59  ;;  %v2930_v1 = vld [vmem:[#allocation11 + $0x28] ss:$16 sps:$4 sm:$0xff]   ;;  %v2989_v10 = vrot.slane %v107_v8, %v135_v7  ;;  %v2991_v11 = vrot.slane %v107_v8, %v139_v9 }
  0x52   :  { %729 = vmatprep.subr.bf16.mxu0 %v2840_v28  ;;  %v2933_v2 = vld [vmem:[#allocation11 + $0xc] ss:$16 sps:$4 sm:$0xff]   ;;  %v2940_v3 = vld [vmem:[#allocation11 + $0x8] ss:$16 sps:$4 sm:$0xff]   ;;  %p2721_p1 = pnand %p2720_p0, %p2714_p11 }
  0x53   :  { %730 = vmatpush1.bf16.msra.mxu0 %v2843_v29 }
  0x54   :  { %731 = vmatprep.subr.bf16.mxu0 %v2848_v30 }
  0x57   :  { %732 = vmatpush1.bf16.msra.mxu0 %v2854_v33 }
  0x58   :  { %2104 = vmatmul.mubr.msk.bf16.gmra.mxu0 %vm189_vm1, %v126_v34  ;;  %2111 = vmatmul.mubr.msk.bf16.vlgmr.msra.gmra.mxu1 %vm189_vm1, %v124_v12 }
  0x59   :  { %769 = vmatpush1.bf16.msra.mxu1 %v2857_v35  ;;  %289 = vmatprep.mubr.bf16.mxu0 %v3591_v0 }
  0x5a   :  { %382 = vmatprep.mubr.bf16.mxu1 %v3591_v0  ;;  %770 = vmatprep.subr.bf16.mxu1 %v2859_v36 }
  0x5b   :  { %733 = vmatprep.subr.bf16.mxu0 %v2862_v39 }
  0x5c   :  { %734 = vmatpush1.bf16.msra.mxu0 %v2868_v41 }
  0x5d   :  { %771 = vmatpush1.bf16.msra.mxu1 %v2866_v40  ;;  %735 = vmatprep.subr.bf16.mxu0 %v2872_v42 }
  0x5e   :  { %772 = vmatprep.subr.bf16.mxu1 %v2876_v43 }
  0x60   :  { %2105 = vmatmul.mubr.msk.bf16.gmra.mxu0 %vm189_vm1, %v127_v44  ;;  %2112 = vmatmul.mubr.msk.bf16.gmra.mxu1 %vm189_vm1, %v125_v26 }
  0x61   :  { %299 = vmatprep.mubr.bf16.mxu0 %v3591_v0  ;;  %392 = vmatprep.mubr.bf16.mxu1 %v3591_v0 }
  0x62   :  { %773 = vmatpush1.bf16.msra.mxu1 %v2880_v45  ;;  %736 = vmatpush1.bf16.msra.mxu0 %v2882_v46 }
  0x63   :  { %737 = vmatprep.subr.bf16.mxu0 %v2886_v47  ;;  %774 = vmatprep.subr.bf16.mxu1 %v2888_v48 }
  0x66   :  { %738 = vmatpush1.bf16.msra.mxu0 %v2893_v51  ;;  %775 = vmatpush1.bf16.msra.mxu1 %v2899_v52 }
  0x67   :  { %739 = vmatprep.subr.bf16.mxu0 %v2903_v53  ;;  %776 = vmatprep.subr.bf16.mxu1 %v2905_v54 }
  0x68   :  { %2106 = vmatmul.mubr.msk.bf16.gmra.mxu0 %vm189_vm1, %v128_v55  ;;  %2113 = vmatmul.mubr.msk.bf16.gmra.mxu1 %vm189_vm1, %v126_v34 }
  0x69   :  { %309 = vmatprep.mubr.bf16.mxu0 %v3591_v0  ;;  %402 = vmatprep.mubr.bf16.mxu1 %v3591_v0 }
  0x6a   :  { %740 = vmatpush1.bf16.msra.mxu0 %v2909_v56  ;;  %777 = vmatpush1.bf16.msra.mxu1 %v2911_v57 }
  0x6b   :  { %778 = vmatprep.subr.bf16.mxu1 %v2915_v58  ;;  %879 = vmatprep.subr.bf16.mxu0 %v2817_v14 }
  0x6e   :  { %779 = vmatpush1.bf16.msra.mxu1 %v2923_v61 }
  0x6f   :  { %780 = vmatprep.subr.bf16.mxu1 %v2926_v62 }
  0x70   :  { %2107 = vmatmul.mubr.msk.bf16.gmra.mxu0 %vm189_vm1, %v129_v63  ;;  %2114 = vmatmul.mubr.msk.bf16.gmra.mxu1 %vm189_vm1, %v127_v44 }
  0x71   :  { %412 = vmatprep.mubr.bf16.mxu1 %v3591_v0  ;;  %757 = vmatprep.mubr.bf16.mxu0 %v3591_v0 }
  0x72   :  { %781 = vmatpush1.bf16.msra.mxu1 %v2930_v1 }
  0x73   :  { %782 = vmatprep.subr.bf16.mxu1 %v2933_v2 }
  0x76   :  { %783 = vmatpush1.bf16.msra.mxu1 %v2940_v3 }
  0x77   :  { %922 = vmatprep.subr.bf16.mxu1 %v2831_v24 }
  0x78   :  { %2115 = vmatmul.mubr.msk.bf16.gmra.mxu1 %vm189_vm1, %v128_v55  ;;  %758 = vmatmul.mubr.bf16.vlgmr.msra.gmra.mxu0 %v2753_v4 }
  0x79   :  { %422 = vmatprep.mubr.bf16.mxu1 %v3591_v0  ;;  %880 = vmatpush1.bf16.msra.mxu0 %v2822_v19 }
  0x7a   :  { %881 = vmatprep.subr.bf16.mxu0 %v2828_v23  ;;  %911 = vmatprep.mubr.bf16.mxu0 %v3591_v0 }
  0x7d   :  { %882 = vmatpush1.bf16.msra.mxu0 %v2834_v25 }
  0x7e   :  { %883 = vmatprep.subr.bf16.mxu0 %v2840_v28 }
  0x80   :  { %2116 = vmatmul.mubr.msk.bf16.gmra.mxu1 %vm189_vm1, %v129_v63 }
  0x81   :  { %432 = vmatprep.mubr.bf16.mxu1 %v3591_v0  ;;  %884 = vmatpush1.bf16.msra.mxu0 %v2843_v29 }
  0x82   :  { %885 = vmatprep.subr.bf16.mxu0 %v2848_v30 }
  0x85   :  { %886 = vmatpush1.bf16.msra.mxu0 %v2854_v33 }
  0x86   :  { %887 = vmatprep.subr.bf16.mxu0 %v2862_v39 }
  0x88   :  { %2117 = vmatmul.mubr.msk.bf16.gmra.mxu1 %vm189_vm1, %v2815_v13 }
  0x89   :  { %442 = vmatprep.mubr.bf16.mxu1 %v3591_v0  ;;  %888 = vmatpush1.bf16.msra.mxu0 %v2868_v41 }
  0x8a   :  { %889 = vmatprep.subr.bf16.mxu0 %v2872_v42 }
  0x8d   :  { %890 = vmatpush1.bf16.msra.mxu0 %v2882_v46 }
  0x8e   :  { %891 = vmatprep.subr.bf16.mxu0 %v2886_v47 }
  0x90   :  { %2118 = vmatmul.mubr.msk.bf16.gmra.mxu1 %vm189_vm1, %v2836_v27 }
  0x91   :  { %800 = vmatprep.mubr.bf16.mxu1 %v3591_v0  ;;  %892 = vmatpush1.bf16.msra.mxu0 %v2893_v51 }
  0x92   :  { %893 = vmatprep.subr.bf16.mxu0 %v2903_v53 }
  0x95   :  { %894 = vmatpush1.bf16.msra.mxu0 %v2909_v56 }
  0x96   :  { %1033 = vmatprep.subr.bf16.mxu0 %v2817_v14 }
  0x98   :  { %801 = vmatmul.mubr.bf16.vlgmr.msra.gmra.mxu1 %v2753_v4 }
  0x99   :  { %923 = vmatpush1.bf16.msra.mxu1 %v2857_v35  ;;  %954 = vmatprep.mubr.bf16.mxu1 %v3591_v0 }
  0x9a   :  { %924 = vmatprep.subr.bf16.mxu1 %v2859_v36 }
  0x9d   :  { %925 = vmatpush1.bf16.msra.mxu1 %v2866_v40 }
  0x9e   :  { %926 = vmatprep.subr.bf16.mxu1 %v2876_v43 }
  0xa1   :  { %927 = vmatpush1.bf16.msra.mxu1 %v2880_v45 }
  0xa2   :  { %928 = vmatprep.subr.bf16.mxu1 %v2888_v48 }
  0xa5   :  { %929 = vmatpush1.bf16.msra.mxu1 %v2899_v52 }
  0xa6   :  { %930 = vmatprep.subr.bf16.mxu1 %v2905_v54 }
  0xa9   :  { %931 = vmatpush1.bf16.msra.mxu1 %v2911_v57 }
  0xaa   :  { %932 = vmatprep.subr.bf16.mxu1 %v2915_v58 }
  0xad   :  { %933 = vmatpush1.bf16.msra.mxu1 %v2923_v61 }
  0xae   :  { %934 = vmatprep.subr.bf16.mxu1 %v2926_v62 }
  0xb1   :  { %935 = vmatpush1.bf16.msra.mxu1 %v2930_v1 }
  0xb2   :  { %936 = vmatprep.subr.bf16.mxu1 %v2933_v2 }
  0xb5   :  { %937 = vmatpush1.bf16.msra.mxu1 %v2940_v3 }
  0xb6   :  { %1076 = vmatprep.subr.bf16.mxu1 %v2831_v24 }
 0x108   :  { %v2993_v12 = vpop.f32.mrf.mxu0  ;;  %v321_v13 = vpop.f32.mrf.mxu1 }
 0x109   :  { %v2996_v15 = vadd.f32 %v321_v13, %v2989_v10 }
 0x10a   :  { %v2998_v16 = vpop.f32.mrf.mxu0  ;;  %v323_v17 = vpop.f32.mrf.mxu1 }
 0x10b   :  { %3593 = vst [vmem:[#allocation19_spill] sm:$0xff] %v2996_v15  ;;  %v3001_v18 = vadd.f32 %v323_v17, %v2991_v11 }
 0x10c   :  { %v3003_v20 = vpop.f32.mrf.mxu0  ;;  %v325_v21 = vpop.f32.mrf.mxu1 }
 0x10d   :  { %3594 = vst [vmem:[#allocation20_spill] sm:$0xff] %v3001_v18  ;;  %v3006_v22 = vadd.f32 %v325_v21, %v2989_v10 }
 0x10e   :  { %v3008_v26 = vpop.f32.mrf.mxu0  ;;  %v327_v27 = vpop.f32.mrf.mxu1 }
 0x10f   :  { %3595 = vst [vmem:[#allocation21_spill] sm:$0xff] %v3006_v22  ;;  %v3011_v31 = vadd.f32 %v327_v27, %v2991_v11 }
 0x110   :  { %v271_v32 = vpop.f32.mrf.mxu0  ;;  %v331_v34 = vpop.f32.mrf.mxu1 }
 0x111   :  { %3596 = vst [vmem:[#allocation22_spill] sm:$0xff] %v3011_v31  ;;  %v3014_v37 = vadd.f32 %v271_v32, %v2989_v10  ;;  %v3017_v38 = vadd.f32 %v331_v34, %v2989_v10 }
 0x112   :  { %v273_v44 = vpop.f32.mrf.mxu0  ;;  %v333_v49 = vpop.f32.mrf.mxu1 }
 0x113   :  { %3597 = vst [vmem:[#allocation23_spill] sm:$0xff] %v3017_v38  ;;  %v3020_v50 = vadd.f32 %v273_v44, %v2991_v11  ;;  %v3023_v55 = vadd.f32 %v333_v49, %v2991_v11  ;;  %v143_v44 = vsub.s32 2, %v134_v6 }
 0x114   :  { %v275_v59 = vpop.f32.mrf.mxu0  ;;  %v335_v60 = vpop.f32.mrf.mxu1 }
 0x115   :  { %3598 = vst [vmem:[#allocation24_spill] sm:$0xff] %v3023_v55  ;;  %v3026_v63 = vadd.f32 %v275_v59, %v2989_v10  ;;  %v3029_v4 = vadd.f32 %v335_v60, %v2989_v10 }
 0x116   :  { %v277_v5 = vpop.f32.mrf.mxu0  ;;  %v337_v7 = vpop.f32.mrf.mxu1 }
 0x117   :  { %3599 = vst [vmem:[#allocation25_spill] sm:$0xff] %v3029_v4  ;;  %v3032_v9 = vadd.f32 %v277_v5, %v2991_v11  ;;  %v3035_v13 = vadd.f32 %v337_v7, %v2991_v11  ;;  %v147_v5 = vsub.s32 3, %v134_v6  ;;  %v3054_v4 = vrot.slane %v107_v8, %v143_v44 }
 0x118   :  { %v281_v17 = vpop.f32.mrf.mxu0  ;;  %v3037_v21 = vpop.f32.mrf.mxu1 }
 0x119   :  { %3600 = vst [vmem:[#allocation26_spill] sm:$0xff] %v3035_v13  ;;  %v3040_v27 = vadd.f32 %v281_v17, %v2989_v10  ;;  %v3059_v31 = vrot.slane %v107_v8, %v147_v5 }
 0x11a   :  { %v283_v32 = vpop.f32.mrf.mxu0  ;;  %v3042_v34 = vpop.f32.mrf.mxu1 }
 0x11b   :  { %3601 = vst [vmem:[#allocation27_spill] sm:$0xff] %v3040_v27  ;;  %v3045_v49 = vadd.f32 %v283_v32, %v2991_v11 }
 0x11c   :  { %v285_v59 = vpop.f32.mrf.mxu0  ;;  %v3047_v60 = vpop.f32.mrf.mxu1 }
 0x11d   :  { %3602 = vst [vmem:[#allocation28_spill] sm:$0xff] %v3045_v49  ;;  %v3050_v7 = vadd.f32 %v285_v59, %v2989_v10 }
 0x11e   :  { %v287_v0 = vpop.f32.mrf.mxu0  ;;  %v3052_v13 = vpop.f32.mrf.mxu1 }
 0x11f   :  { %3603 = vst [vmem:[#allocation29_spill] sm:$0xff] %v3050_v7  ;;  %v3057_v17 = vadd.f32 %v287_v0, %v2991_v11 }
 0x120   :  { %v291_v55 = vpop.f32.mrf.mxu0  ;;  %v384_v38 = vpop.f32.mrf.mxu1 }
 0x121   :  { %3604 = vst [vmem:[#allocation30_spill] sm:$0xff] %v3057_v17  ;;  %v3062_v32 = vadd.f32 %v291_v55, %v2989_v10  ;;  %v3065_v6 = vadd.f32 %v384_v38, %v3054_v4 }
 0x122   :  { %v293_v59 = vpop.f32.mrf.mxu0  ;;  %v386_v22 = vpop.f32.mrf.mxu1 }
 0x123   :  { %3605 = vst [vmem:[#allocation31_spill] sm:$0xff] %v3062_v32  ;;  %v3068_v18 = vadd.f32 %v293_v59, %v2991_v11  ;;  %v3071_v44 = vadd.f32 %v386_v22, %v3059_v31 }
 0x124   :  { %v295_v0 = vpop.f32.mrf.mxu0  ;;  %v388_v15 = vpop.f32.mrf.mxu1 }
 0x125   :  { %3606 = vst [vmem:[#allocation32_spill] sm:$0xff] %v3068_v18  ;;  %3607 = vst [vmem:[#allocation33_spill] sm:$0xff] %v3071_v44  ;;  %v3074_v17 = vadd.f32 %v295_v0, %v2989_v10  ;;  %v3077_v8 = vadd.f32 %v388_v15, %v3054_v4 }
 0x126   :  { %v297_v55 = vpop.f32.mrf.mxu0  ;;  %v390_v5 = vpop.f32.mrf.mxu1 }
 0x127   :  { %3608 = vst [vmem:[#allocation34_spill] sm:$0xff] %v3074_v17  ;;  %3609 = vst [vmem:[#allocation35_spill] sm:$0xff] %v3077_v8  ;;  %v3080_v38 = vadd.f32 %v297_v55, %v2991_v11  ;;  %v3083_v32 = vadd.f32 %v390_v5, %v3059_v31 }
 0x128   :  { %v301_v59 = vpop.f32.mrf.mxu0  ;;  %v394_v18 = vpop.f32.mrf.mxu1 }
 0x129   :  { %3610 = vst [vmem:[#allocation36_spill] sm:$0xff] %v3080_v38  ;;  %3611 = vst [vmem:[#allocation37_spill] sm:$0xff] %v3083_v32  ;;  %v3086_v22 = vadd.f32 %v301_v59, %v2989_v10  ;;  %v3089_v7 = vadd.f32 %v394_v18, %v3054_v4 }
 0x12a   :  { %v303_v0 = vpop.f32.mrf.mxu0  ;;  %v396_v17 = vpop.f32.mrf.mxu1 }
 0x12b   :  { %3612 = vst [vmem:[#allocation38_spill] sm:$0xff] %v3086_v22  ;;  %3613 = vst [vmem:[#allocation39_spill] sm:$0xff] %v3089_v7  ;;  %v3092_v15 = vadd.f32 %v303_v0, %v2991_v11  ;;  %v3095_v49 = vadd.f32 %v396_v17, %v3059_v31 }
 0x12c   :  { %v305_v55 = vpop.f32.mrf.mxu0  ;;  %v398_v38 = vpop.f32.mrf.mxu1 }
 0x12d   :  { %3614 = vst [vmem:[#allocation40_spill] sm:$0xff] %v3092_v15  ;;  %3615 = vst [vmem:[#allocation41_spill] sm:$0xff] %v3095_v49  ;;  %v3098_v5 = vadd.f32 %v305_v55, %v2989_v10  ;;  %v3101_v27 = vadd.f32 %v398_v38, %v3054_v4 }
 0x12e   :  { %v307_v59 = vpop.f32.mrf.mxu0  ;;  %v400_v22 = vpop.f32.mrf.mxu1 }
 0x12f   :  { %3616 = vst [vmem:[#allocation42_spill] sm:$0xff] %v3098_v5  ;;  %3617 = vst [vmem:[#allocation43_spill] sm:$0xff] %v3101_v27  ;;  %v3104_v18 = vadd.f32 %v307_v59, %v2991_v11  ;;  %v3107_v7 = vadd.f32 %v400_v22, %v3059_v31 }
 0x130   :  { %v311_v0 = vpop.f32.mrf.mxu0  ;;  %v404_v15 = vpop.f32.mrf.mxu1 }
 0x131   :  { %3618 = vst [vmem:[#allocation44_spill] sm:$0xff] %v3104_v18  ;;  %3619 = vst [vmem:[#allocation45_spill] sm:$0xff] %v3107_v7  ;;  %v3110_v17 = vadd.f32 %v311_v0, %v2989_v10  ;;  %v3113_v49 = vadd.f32 %v404_v15, %v3054_v4 }
 0x132   :  { %v313_v55 = vpop.f32.mrf.mxu0  ;;  %v406_v5 = vpop.f32.mrf.mxu1 }
 0x133   :  { %3620 = vst [vmem:[#allocation46_spill] sm:$0xff] %v3110_v17  ;;  %3621 = vst [vmem:[#allocation47_spill] sm:$0xff] %v3113_v49  ;;  %v3116_v38 = vadd.f32 %v313_v55, %v2991_v11  ;;  %v3119_v27 = vadd.f32 %v406_v5, %v3059_v31 }
 0x134   :  { %v315_v59 = vpop.f32.mrf.mxu0  ;;  %v408_v18 = vpop.f32.mrf.mxu1 }
 0x135   :  { %3622 = vst [vmem:[#allocation48_spill] sm:$0xff] %v3116_v38  ;;  %3623 = vst [vmem:[#allocation49_spill] sm:$0xff] %v3119_v27  ;;  %v3122_v22 = vadd.f32 %v315_v59, %v2989_v10  ;;  %v3125_v7 = vadd.f32 %v408_v18, %v3054_v4 }
 0x136   :  { %v317_v0 = vpop.f32.mrf.mxu0  ;;  %v410_v17 = vpop.f32.mrf.mxu1 }
 0x137   :  { %3624 = vst [vmem:[#allocation50_spill] sm:$0xff] %v3122_v22  ;;  %3625 = vst [vmem:[#allocation51_spill] sm:$0xff] %v3125_v7  ;;  %v3128_v15 = vadd.f32 %v317_v0, %v2991_v11  ;;  %v3131_v49 = vadd.f32 %v410_v17, %v3059_v31  ;;  %v262_v22 = vadd.f32 %v2993_v12, %v2989_v10 }
 0x138   :  { %v414_v55 = vpop.f32.mrf.mxu1  ;;  %v759_v38 = vpop.f32.mrf.mxu0  ;;  %v264_v17 = vadd.f32 %v2998_v16, %v2991_v11 }
 0x139   :  { %3626 = vst [vmem:[#allocation52_spill] sm:$0xff] %v3128_v15  ;;  %3627 = vst [vmem:[#allocation53_spill] sm:$0xff] %v3131_v49  ;;  %v3134_v5 = vadd.f32 %v414_v55, %v3054_v4  ;;  %v811_v7 = vadd.f32 %v759_v38, %v262_v22 }
 0x13a   :  { %v416_v27 = vpop.f32.mrf.mxu1  ;;  %v761_v32 = vpop.f32.mrf.mxu0 }
 0x13b   :  { %3628 = vst [vmem:[#allocation54_spill] sm:$0xff] %v3134_v5  ;;  %v3137_v59 = vadd.f32 %v416_v27, %v3059_v31  ;;  %v812_v5 = vadd.f32 %v761_v32, %v264_v17  ;;  %v266_v27 = vadd.f32 %v3003_v20, %v2989_v10  ;;  %v2151_v8 = vmul.f32 -1.442695, %v811_v7 }
 0x13c   :  { %v418_v18 = vpop.f32.mrf.mxu1  ;;  %v763_v15 = vpop.f32.mrf.mxu0 }
 0x13d   :  { %3629 = vst [vmem:[#allocation55_spill] sm:$0xff] %v3137_v59  ;;  %v3142_v0 = vadd.f32 %v418_v18, %v3054_v4  ;;  %v268_v18 = vadd.f32 %v3008_v26, %v2991_v11  ;;  %v815_v16 = vadd.f32 %v763_v15, %v266_v27  ;;  %2325 = vpow2.f32 %v2151_v8 }
 0x13e   :  { %v420_v49 = vpop.f32.mrf.mxu1  ;;  %v765_v59 = vpop.f32.mrf.mxu0 }
 0x13f   :  { %3630 = vst [vmem:[#allocation56_spill] sm:$0xff] %v3142_v0  ;;  %v3147_v55 = vadd.f32 %v420_v49, %v3059_v31  ;;  %v2152_v49 = vmul.f32 -1.442695, %v812_v5  ;;  %v816_v22 = vadd.f32 %v765_v59, %v268_v18  ;;  %v2154_v20 = vmul.f32 -1.442695, %v815_v16 }
 0x140   :  { %v424_v44 = vpop.f32.mrf.mxu1 }
 0x141   :  { %v3152_v12 = vadd.f32 %v424_v44, %v3054_v4  ;;  %2327 = vpow2.f32 %v2152_v49  ;;  %v2155_v11 = vmul.f32 -1.442695, %v816_v22 }
 0x142   :  { %v426_v0 = vpop.f32.mrf.mxu1  ;;  %2329 = vpow2.f32 %v2154_v20 }
 0x143   :  { %v3157_v38 = vadd.f32 %v426_v0, %v3059_v31  ;;  %2331 = vpow2.f32 %v2155_v11 }
 0x144   :  { %v428_v32 = vpop.f32.mrf.mxu1 }
 0x145   :  { %v3160_v17 = vadd.f32 %v428_v32, %v3054_v4 }
 0x146   :  { %v430_v10 = vpop.f32.mrf.mxu1 }
 0x147   :  { %v3163_v44 = vadd.f32 %v430_v10, %v3059_v31 }
 0x148   :  { %v434_v26 = vpop.f32.mrf.mxu1 }
 0x149   :  { %3631 = vst [vmem:[#allocation57_spill] sm:$0xff] %v3163_v44  ;;  %v3166_v7 = vadd.f32 %v434_v26, %v3054_v4 }
 0x14a   :  { %v436_v15 = vpop.f32.mrf.mxu1  ;;  %v2326_v32 = vpop.eup %2325 }
 0x14b   :  { %3632 = vst [vmem:[#allocation58_spill] sm:$0xff] %v3166_v7  ;;  %v3169_v5 = vadd.f32 %v436_v15, %v3059_v31  ;;  %v375_v15 = vadd.f32 %v3037_v21, %v3054_v4 }
 0x14c   :  { %v438_v59 = vpop.f32.mrf.mxu1 }
 0x14d   :  { %3633 = vst [vmem:[#allocation59_spill] sm:$0xff] %v3169_v5  ;;  %v3172_v0 = vadd.f32 %v438_v59, %v3054_v4  ;;  %v837_v59 = vadd.f32 1.0, %v2326_v32 }
 0x14e   :  { %v440_v8 = vpop.f32.mrf.mxu1  ;;  %v2328_v20 = vpop.eup %2327 }
 0x14f   :  { %3634 = vst [vmem:[#allocation60_spill] sm:$0xff] %v3172_v0  ;;  %v3175_v27 = vadd.f32 %v440_v8, %v3059_v31  ;;  %2333 = vrcp.f32 %v837_v59 }
 0x150   :  { %v444_v18 = vpop.f32.mrf.mxu1 }
 0x151   :  { %3635 = vst [vmem:[#allocation61_spill] sm:$0xff] %v3175_v27  ;;  %v3178_v16 = vadd.f32 %v444_v18, %v3054_v4  ;;  %v2330_v18 = vpop.eup %2329 }
 0x152   :  { %v446_v49 = vpop.f32.mrf.mxu1  ;;  %v2332_v5 = vpop.eup %2331  ;;  %v840_v0 = vadd.f32 1.0, %v2330_v18 }
 0x153   :  { %3636 = vst [vmem:[#allocation62_spill] sm:$0xff] %v3178_v16  ;;  %v3181_v22 = vadd.f32 %v446_v49, %v3059_v31  ;;  %v838_v16 = vadd.f32 1.0, %v2328_v20  ;;  %v377_v49 = vadd.f32 %v3042_v34, %v3059_v31  ;;  %v841_v32 = vadd.f32 1.0, %v2332_v5 }
 0x154   :  { %v448_v10 = vpop.f32.mrf.mxu1  ;;  %v381_v20 = vadd.f32 %v3052_v13, %v3059_v31 }
 0x155   :  { %3637 = vst [vmem:[#allocation63_spill] sm:$0xff] %v3181_v22  ;;  %v3184_v11 = vadd.f32 %v448_v10, %v3054_v4  ;;  %v379_v10 = vadd.f32 %v3047_v60, %v3054_v4  ;;  %2335 = vrcp.f32 %v838_v16 }
 0x156   :  { %v450_v26 = vpop.f32.mrf.mxu1 }
 0x157   :  { %3638 = vst [vmem:[#allocation64_spill] sm:$0xff] %v3184_v11  ;;  %v3189_v8 = vadd.f32 %v450_v26, %v3059_v31 }
 0x158   :  { %v802_v27 = vpop.f32.mrf.mxu1 }
 0x159   :  { %3639 = vst [vmem:[#allocation65_spill] sm:$0xff] %v3189_v8  ;;  %v813_v22 = vadd.f32 %v802_v27, %v375_v15 }
 0x15a   :  { %v804_v11 = vpop.f32.mrf.mxu1 }
 0x15b   :  { %v2153_v7 = vmul.f32 -1.442695, %v813_v22  ;;  %v814_v21 = vadd.f32 %v804_v11, %v377_v49 }
 0x15c   :  { %v806_v26 = vpop.f32.mrf.mxu1  ;;  %v2334_v4 = vpop.eup %2333 }
 0x15d   :  { %2337 = vpow2.f32 %v2153_v7  ;;  %v817_v8 = vadd.f32 %v806_v26, %v379_v10 }
 0x15e   :  { %2339 = vtanh.f32 %v814_v21  ;;  %v808_v44 = vpop.f32.mrf.mxu1 }
 0x15f   :  { %2341 = vrcp.f32 %v840_v0  ;;  %v2156_v34 = vmul.f32 -1.442695, %v817_v8  ;;  %v818_v27 = vadd.f32 %v808_v44, %v381_v20 }
 0x160   :  { %2343 = vrcp.f32 %v841_v32 }
 0x161   :  { %2345 = vpow2.f32 %v2156_v34 }
 0x162   :  { %2347 = vtanh.f32 %v818_v27  ;;  %v2336_v60 = vpop.eup %2335 }
 0x163   :  { %v857_v5 = vmul.f32 0.0, %v2336_v60 }
 0x16a   :  { %v2338_v22 = vpop.eup %2337 }
 0x16b   :  { %v2340_v11 = vpop.eup %2339  ;;  %v839_v18 = vadd.f32 1.0, %v2338_v22 }
 0x16c   :  { %v2342_v16 = vpop.eup %2341  ;;  %v859_v15 = vmul.f32 %v2340_v11, %v2334_v4  ;;  %v3640_v4 = vmov 0  }
 0x16d   :  { %v2344_v59 = vpop.eup %2343  ;;  %2349 = vrcp.f32 %v839_v18 }
 0x16e   :  { %v2346_v31 = vpop.eup %2345  ;;  %v3197_v13 = vadd.f32 %v859_v15, %v857_v5  ;;  %v858_v0 = vmul.f32 0.0, %v2344_v59 }
 0x16f   :  { %v2348_v7 = vpop.eup %2347  ;;  %v842_v49 = vadd.f32 1.0, %v2346_v31 }
 0x170   :  { %v860_v8 = vmul.f32 %v2348_v7, %v2342_v16  ;;  %2351 = vtanh.f32 %v3197_v13 }
 0x171   :  { %2353 = vrcp.f32 %v842_v49 }
 0x172   :  { %v3200_v44 = vadd.f32 %v860_v8, %v858_v0  ;;  %v3641_v8 = vld [vmem:[#allocation35_spill] sm:$0xff] }
 0x174   :  { %2355 = vtanh.f32 %v3200_v44 }
 0x17a   :  { %v2350_v10 = vpop.eup %2349 }
 0x17d   :  { %v2352_v21 = vpop.eup %2351 }
 0x17e   :  { %v2354_v32 = vpop.eup %2353  ;;  %v865_v20 = vmul.f32 %v2352_v21, %v2350_v10  ;;  %v3642_v21 = vld [vmem:[#allocation33_spill] sm:$0xff] }
 0x181   :  { %v2356_v26 = vpop.eup %2355 }
 0x182   :  { %v866_v34 = vmul.f32 %v2356_v26, %v2354_v32 }
 0x184   :  { %v878_v27 = vpack.c.bf16 %v866_v34, %v865_v20 }
 0x186   :  { %912 = vmatmul.mubr.bf16.vlgmr.msra.gmra.mxu0 %v878_v27  ;;  %955 = vmatmul.mubr.bf16.vlgmr.msra.gmra.mxu1 %v878_v27 }
 0x187   :  { %1034 = vmatpush1.bf16.msra.mxu0 %v2822_v19  ;;  %1077 = vmatpush1.bf16.msra.mxu1 %v2857_v35 }
 0x188   :  { %1035 = vmatprep.subr.bf16.mxu0 %v2828_v23  ;;  %1078 = vmatprep.subr.bf16.mxu1 %v2859_v36 }
 0x189   :  { %1065 = vmatprep.mubr.bf16.mxu0 %v3640_v4  ;;  %1108 = vmatprep.mubr.bf16.mxu1 %v3640_v4 }
 0x18b   :  { %1036 = vmatpush1.bf16.msra.mxu0 %v2834_v25  ;;  %1079 = vmatpush1.bf16.msra.mxu1 %v2866_v40 }
 0x18c   :  { %1037 = vmatprep.subr.bf16.mxu0 %v2840_v28  ;;  %1080 = vmatprep.subr.bf16.mxu1 %v2876_v43 }
 0x18f   :  { %1038 = vmatpush1.bf16.msra.mxu0 %v2843_v29  ;;  %1081 = vmatpush1.bf16.msra.mxu1 %v2880_v45 }
 0x190   :  { %1039 = vmatprep.subr.bf16.mxu0 %v2848_v30  ;;  %1082 = vmatprep.subr.bf16.mxu1 %v2888_v48 }
 0x193   :  { %1040 = vmatpush1.bf16.msra.mxu0 %v2854_v33  ;;  %1083 = vmatpush1.bf16.msra.mxu1 %v2899_v52 }
 0x194   :  { %1041 = vmatprep.subr.bf16.mxu0 %v2862_v39  ;;  %1084 = vmatprep.subr.bf16.mxu1 %v2905_v54 }
 0x197   :  { %1042 = vmatpush1.bf16.msra.mxu0 %v2868_v41  ;;  %1085 = vmatpush1.bf16.msra.mxu1 %v2911_v57 }
 0x198   :  { %1043 = vmatprep.subr.bf16.mxu0 %v2872_v42  ;;  %1086 = vmatprep.subr.bf16.mxu1 %v2915_v58 }
 0x19b   :  { %1044 = vmatpush1.bf16.msra.mxu0 %v2882_v46  ;;  %1087 = vmatpush1.bf16.msra.mxu1 %v2923_v61 }
 0x19c   :  { %1045 = vmatprep.subr.bf16.mxu0 %v2886_v47  ;;  %1088 = vmatprep.subr.bf16.mxu1 %v2926_v62 }
 0x19f   :  { %1046 = vmatpush1.bf16.msra.mxu0 %v2893_v51  ;;  %1089 = vmatpush1.bf16.msra.mxu1 %v2930_v1 }
 0x1a0   :  { %1047 = vmatprep.subr.bf16.mxu0 %v2903_v53  ;;  %1090 = vmatprep.subr.bf16.mxu1 %v2933_v2 }
 0x1a3   :  { %1048 = vmatpush1.bf16.msra.mxu0 %v2909_v56  ;;  %1091 = vmatpush1.bf16.msra.mxu1 %v2940_v3 }
 0x1a4   :  { %1187 = vmatprep.subr.bf16.mxu0 %v2817_v14  ;;  %1230 = vmatprep.subr.bf16.mxu1 %v2831_v24 }
 0x246   :  { %v913_v19 = vpop.f32.mrf.mxu0  ;;  %v956_v16 = vpop.f32.mrf.mxu1 }
 0x247   :  { %v965_v60 = vadd.f32 %v913_v19, %v3014_v37  ;;  %v967_v37 = vadd.f32 %v956_v16, %v3065_v6  ;;  %v3643_v19 = vld [vmem:[#allocation37_spill] sm:$0xff] }
 0x248   :  { %v915_v22 = vpop.f32.mrf.mxu0  ;;  %v958_v7 = vpop.f32.mrf.mxu1 }
 0x249   :  { %v2157_v11 = vmul.f32 -1.442695, %v965_v60  ;;  %v966_v5 = vadd.f32 %v915_v22, %v3020_v50  ;;  %v2159_v50 = vmul.f32 -1.442695, %v967_v37  ;;  %v968_v32 = vadd.f32 %v958_v7, %v3642_v21 }
 0x24a   :  { %v917_v15 = vpop.f32.mrf.mxu0  ;;  %v960_v0 = vpop.f32.mrf.mxu1 }
 0x24b   :  { %2357 = vpow2.f32 %v2157_v11  ;;  %v2158_v59 = vmul.f32 -1.442695, %v966_v5  ;;  %v969_v18 = vadd.f32 %v917_v15, %v3026_v63  ;;  %v971_v10 = vadd.f32 %v960_v0, %v3641_v8 }
 0x24c   :  { %v919_v31 = vpop.f32.mrf.mxu0  ;;  %v962_v26 = vpop.f32.mrf.mxu1 }
 0x24d   :  { %2359 = vpow2.f32 %v2158_v59  ;;  %v2160_v49 = vmul.f32 -1.442695, %v969_v18  ;;  %v970_v14 = vadd.f32 %v919_v31, %v3032_v9  ;;  %v2162_v63 = vmul.f32 -1.442695, %v971_v10 }
 0x24e   :  { %v972_v9 = vadd.f32 %v962_v26, %v3643_v19 }
 0x24f   :  { %2361 = vpow2.f32 %v2160_v49  ;;  %v2161_v24 = vmul.f32 -1.442695, %v970_v14 }
 0x251   :  { %2363 = vpow2.f32 %v2161_v24 }
 0x252   :  { %2365 = vpow2.f32 %v2159_v50 }
 0x253   :  { %2367 = vtanh.f32 %v968_v32 }
 0x258   :  { %v2358_v20 = vpop.eup %2357 }
 0x259   :  { %v991_v34 = vadd.f32 1.0, %v2358_v20 }
 0x25a   :  { %v2360_v27 = vpop.eup %2359 }
 0x25b   :  { %2369 = vrcp.f32 %v991_v34  ;;  %v992_v60 = vadd.f32 1.0, %v2360_v27 }
 0x25c   :  { %v2362_v22 = vpop.eup %2361  ;;  %2371 = vpow2.f32 %v2162_v63 }
 0x25d   :  { %2373 = vrcp.f32 %v992_v60  ;;  %v994_v6 = vadd.f32 1.0, %v2362_v22  ;;  %v3650_v22 = vld [vmem:[#allocation41_spill] sm:$0xff] }
 0x25e   :  { %v2364_v11 = vpop.eup %2363  ;;  %2375 = vtanh.f32 %v972_v9  ;;  %v3253_v9 = vld [vmem:[#allocation11 + $0xe0] ss:$16 sps:$4 sm:$0xff]  }
 0x25f   :  { %2377 = vrcp.f32 %v994_v6  ;;  %v995_v16 = vadd.f32 1.0, %v2364_v11  ;;  %v2366_v5 = vpop.eup %2365 }
 0x260   :  { %v2368_v15 = vpop.eup %2367  ;;  %v993_v37 = vadd.f32 1.0, %v2366_v5 }
 0x261   :  { %2379 = vrcp.f32 %v995_v16 }
 0x262   :  { %2381 = vrcp.f32 %v993_v37 }
 0x268   :  { %v2370_v59 = vpop.eup %2369 }
 0x269   :  { %v2372_v18 = vpop.eup %2371  ;;  %v1013_v31 = vmul.f32 %v2370_v59, %v2368_v15 }
 0x26a   :  { %v2374_v7 = vpop.eup %2373  ;;  %v996_v50 = vadd.f32 1.0, %v2372_v18  ;;  %v3651_v18 = vld [vmem:[#allocation45_spill] sm:$0xff] }
 0x26b   :  { %v2376_v49 = vpop.eup %2375  ;;  %v1011_v14 = vmul.f32 %v2374_v7, %v3197_v13 }
 0x26c   :  { %v2378_v24 = vpop.eup %2377 }
 0x26d   :  { %v3246_v0 = vadd.f32 %v1013_v31, %v1011_v14  ;;  %v1014_v8 = vmul.f32 %v2378_v24, %v2376_v49 }
 0x26e   :  { %v2380_v10 = vpop.eup %2379 }
 0x26f   :  { %v1012_v21 = vmul.f32 %v2380_v10, %v3200_v44  ;;  %2383 = vtanh.f32 %v3246_v0  ;;  %v2382_v26 = vpop.eup %2381 }
 0x270   :  { %2385 = vrcp.f32 %v996_v50 }
 0x271   :  { %v3250_v32 = vadd.f32 %v1014_v8, %v1012_v21 }
 0x273   :  { %2387 = vtanh.f32 %v3250_v32 }
 0x27c   :  { %v2384_v20 = vpop.eup %2383 }
 0x27d   :  { %v2386_v13 = vpop.eup %2385  ;;  %v1019_v34 = vmul.f32 %v2384_v20, %v2382_v26 }
 0x280   :  { %v2388_v63 = vpop.eup %2387 }
 0x281   :  { %v1020_v27 = vmul.f32 %v2388_v63, %v2386_v13 }
 0x283   :  { %v1032_v19 = vpack.c.bf16 %v1020_v27, %v1019_v34 }
 0x285   :  { %1066 = vmatmul.mubr.bf16.vlgmr.msra.gmra.mxu0 %v1032_v19  ;;  %1109 = vmatmul.mubr.bf16.vlgmr.msra.gmra.mxu1 %v1032_v19 }
 0x286   :  { %1188 = vmatpush1.bf16.msra.mxu0 %v3253_v9  ;;  %1231 = vmatpush1.bf16.msra.mxu1 %v2857_v35 }
 0x287   :  { %1189 = vmatprep.subr.bf16.mxu0 %v2828_v23  ;;  %1232 = vmatprep.subr.bf16.mxu1 %v2859_v36  ;;  %v3287_v23 = vld [vmem:[#allocation11 + $0xe4] ss:$16 sps:$4 sm:$0xff]  }
 0x288   :  { %1219 = vmatprep.mubr.bf16.mxu0 %v3640_v4  ;;  %1262 = vmatprep.mubr.bf16.mxu1 %v3640_v4 }
 0x28a   :  { %1190 = vmatpush1.bf16.msra.mxu0 %v2834_v25  ;;  %1233 = vmatpush1.bf16.msra.mxu1 %v2866_v40  ;;  %v3290_v25 = vld [vmem:[#allocation11 + $0xec] ss:$16 sps:$4 sm:$0xff]  }
 0x28b   :  { %1191 = vmatprep.subr.bf16.mxu0 %v2840_v28  ;;  %1234 = vmatprep.subr.bf16.mxu1 %v2876_v43  ;;  %v3646_v43 = vld [vmem:[#allocation29_spill] sm:$0xff] }
 0x28e   :  { %1192 = vmatpush1.bf16.msra.mxu0 %v2843_v29  ;;  %1235 = vmatpush1.bf16.msra.mxu1 %v2880_v45  ;;  %v3644_v29 = vld [vmem:[#allocation27_spill] sm:$0xff] }
 0x28f   :  { %1193 = vmatprep.subr.bf16.mxu0 %v2848_v30  ;;  %1236 = vmatprep.subr.bf16.mxu1 %v2888_v48 }
 0x292   :  { %1194 = vmatpush1.bf16.msra.mxu0 %v2854_v33  ;;  %1237 = vmatpush1.bf16.msra.mxu1 %v2899_v52 }
 0x293   :  { %1195 = vmatprep.subr.bf16.mxu0 %v2862_v39  ;;  %1238 = vmatprep.subr.bf16.mxu1 %v2905_v54  ;;  %v3645_v39 = vld [vmem:[#allocation28_spill] sm:$0xff]  ;;  %v3648_v54 = vld [vmem:[#allocation39_spill] sm:$0xff] }
 0x296   :  { %1196 = vmatpush1.bf16.msra.mxu0 %v2868_v41  ;;  %1239 = vmatpush1.bf16.msra.mxu1 %v2911_v57 }
 0x297   :  { %1197 = vmatprep.subr.bf16.mxu0 %v2872_v42  ;;  %1240 = vmatprep.subr.bf16.mxu1 %v2915_v58  ;;  %v3649_v58 = vld [vmem:[#allocation43_spill] sm:$0xff] }
 0x29a   :  { %1198 = vmatpush1.bf16.msra.mxu0 %v2882_v46  ;;  %1241 = vmatpush1.bf16.msra.mxu1 %v2923_v61 }
 0x29b   :  { %1199 = vmatprep.subr.bf16.mxu0 %v2886_v47  ;;  %1242 = vmatprep.subr.bf16.mxu1 %v2926_v62 }
 0x29e   :  { %1200 = vmatpush1.bf16.msra.mxu0 %v2893_v51  ;;  %1243 = vmatpush1.bf16.msra.mxu1 %v2930_v1  ;;  %v3647_v51 = vld [vmem:[#allocation30_spill] sm:$0xff] }
 0x29f   :  { %1201 = vmatprep.subr.bf16.mxu0 %v2903_v53  ;;  %1244 = vmatprep.subr.bf16.mxu1 %v2933_v2 }
 0x2a2   :  { %1202 = vmatpush1.bf16.msra.mxu0 %v2909_v56  ;;  %1245 = vmatpush1.bf16.msra.mxu1 %v2940_v3 }
 0x2a3   :  { %1341 = vmatprep.subr.bf16.mxu0 %v3287_v23  ;;  %1384 = vmatprep.subr.bf16.mxu1 %v3290_v25 }
 0x345   :  { %v1067_v28 = vpop.f32.mrf.mxu0  ;;  %v1110_v36 = vpop.f32.mrf.mxu1 }
 0x346   :  { %v1119_v30 = vadd.f32 %v1067_v28, %v3644_v29  ;;  %v1121_v56 = vadd.f32 %v1110_v36, %v3648_v54  ;;  %v3336_v54 = vld [vmem:[#allocation11 + $0xa8] ss:$16 sps:$4 sm:$0xff]  }
 0x347   :  { %v1069_v33 = vpop.f32.mrf.mxu0  ;;  %v1112_v47 = vpop.f32.mrf.mxu1 }
 0x348   :  { %v2163_v35 = vmul.f32 -1.442695, %v1119_v30  ;;  %v1120_v40 = vadd.f32 %v1069_v33, %v3645_v39  ;;  %v2165_v60 = vmul.f32 -1.442695, %v1121_v56  ;;  %v1122_v6 = vadd.f32 %v1112_v47, %v3650_v22  ;;  %v3321_v47 = vld [vmem:[#allocation11 + $0xc0] ss:$16 sps:$4 sm:$0xff]  }
 0x349   :  { %v1071_v41 = vpop.f32.mrf.mxu0  ;;  %v1114_v57 = vpop.f32.mrf.mxu1  ;;  %v3339_v56 = vld [vmem:[#allocation11 + $0x84] ss:$16 sps:$4 sm:$0xff]   ;;  %v3354_v22 = vld [vmem:[#allocation11 + $0x6c] ss:$16 sps:$4 sm:$0xff]  }
 0x34a   :  { %2389 = vpow2.f32 %v2163_v35  ;;  %v2164_v42 = vmul.f32 -1.442695, %v1120_v40  ;;  %v1123_v45 = vadd.f32 %v1071_v41, %v3646_v43  ;;  %v1125_v44 = vadd.f32 %v1114_v57, %v3649_v58  ;;  %v3342_v57 = vld [vmem:[#allocation11 + $0x8c] ss:$16 sps:$4 sm:$0xff]   ;;  %v3345_v58 = vld [vmem:[#allocation11 + $0x80] ss:$16 sps:$4 sm:$0xff]  }
 0x34b   :  { %v1073_v46 = vpop.f32.mrf.mxu0  ;;  %v1116_v11 = vpop.f32.mrf.mxu1 }
 0x34c   :  { %2391 = vpow2.f32 %v2164_v42  ;;  %v2166_v48 = vmul.f32 -1.442695, %v1123_v45  ;;  %v1124_v52 = vadd.f32 %v1073_v46, %v3647_v51  ;;  %v2168_v5 = vmul.f32 -1.442695, %v1125_v44  ;;  %v3313_v45 = vld [vmem:[#allocation11 + $0xc4] ss:$16 sps:$4 sm:$0xff]  }
 0x34d   :  { %v1126_v31 = vadd.f32 %v1116_v11, %v3651_v18  ;;  %v3316_v46 = vld [vmem:[#allocation11 + $0xcc] ss:$16 sps:$4 sm:$0xff]   ;;  %v3327_v51 = vld [vmem:[#allocation11 + $0xa4] ss:$16 sps:$4 sm:$0xff]   ;;  %v3348_v44 = vld [vmem:[#allocation11 + $0x88] ss:$16 sps:$4 sm:$0xff]  }
 0x34e   :  { %2393 = vpow2.f32 %v2166_v48  ;;  %v2167_v53 = vmul.f32 -1.442695, %v1124_v52  ;;  %v3324_v48 = vld [vmem:[#allocation11 + $0xc8] ss:$16 sps:$4 sm:$0xff]   ;;  %v3330_v52 = vld [vmem:[#allocation11 + $0xac] ss:$16 sps:$4 sm:$0xff]  }
 0x34f   :  { %v3360_v11 = vld [vmem:[#allocation11 + $0x68] ss:$16 sps:$4 sm:$0xff]   ;;  %v3377_v18 = vld [vmem:[#allocation11 + $0x20] ss:$16 sps:$4 sm:$0xff]  }
 0x350   :  { %2395 = vpow2.f32 %v2167_v53  ;;  %v3333_v53 = vld [vmem:[#allocation11 + $0xa0] ss:$16 sps:$4 sm:$0xff]  }
 0x351   :  { %2397 = vpow2.f32 %v2165_v60  ;;  %v3351_v60 = vld [vmem:[#allocation11 + $0x64] ss:$16 sps:$4 sm:$0xff]  }
 0x352   :  { %2399 = vtanh.f32 %v1122_v6  ;;  %v3357_v6 = vld [vmem:[#allocation11 + $0x60] ss:$16 sps:$4 sm:$0xff]  }
 0x357   :  { %v2390_v16 = vpop.eup %2389 }
 0x358   :  { %v1145_v15 = vadd.f32 1.0, %v2390_v16  ;;  %v3363_v16 = vld [vmem:[#allocation11 + $0x44] ss:$16 sps:$4 sm:$0xff]  }
 0x359   :  { %v2392_v59 = vpop.eup %2391 }
 0x35a   :  { %2401 = vrcp.f32 %v1145_v15  ;;  %v1146_v7 = vadd.f32 1.0, %v2392_v59  ;;  %v3369_v15 = vld [vmem:[#allocation11 + $0x40] ss:$16 sps:$4 sm:$0xff]   ;;  %v3373_v59 = vld [vmem:[#allocation11 + $0x24] ss:$16 sps:$4 sm:$0xff]  }
 0x35b   :  { %v2394_v49 = vpop.eup %2393  ;;  %2403 = vpow2.f32 %v2168_v5  ;;  %v3366_v5 = vld [vmem:[#allocation11 + $0x4c] ss:$16 sps:$4 sm:$0xff]  }
 0x35c   :  { %2405 = vrcp.f32 %v1146_v7  ;;  %v1148_v14 = vadd.f32 1.0, %v2394_v49  ;;  %v3385_v7 = vld [vmem:[#allocation11] ss:$16 sps:$4 sm:$0xff]  }
 0x35d   :  { %v2396_v24 = vpop.eup %2395  ;;  %2407 = vtanh.f32 %v1126_v31  ;;  %v3381_v31 = vld [vmem:[#allocation11 + $0x4] ss:$16 sps:$4 sm:$0xff]  }
 0x35e   :  { %2409 = vrcp.f32 %v1148_v14  ;;  %v1149_v37 = vadd.f32 1.0, %v2396_v24  ;;  %v2398_v8 = vpop.eup %2397 }
 0x35f   :  { %v2400_v10 = vpop.eup %2399  ;;  %v1147_v27 = vadd.f32 1.0, %v2398_v8 }
 0x360   :  { %2411 = vrcp.f32 %v1149_v37  ;;  %v3653_v37 = vld [vmem:[#allocation32_spill] sm:$0xff] }
 0x361   :  { %2413 = vrcp.f32 %v1147_v27  ;;  %v3656_v27 = vld [vmem:[#allocation47_spill] sm:$0xff] }
 0x367   :  { %v2402_v50 = vpop.eup %2401 }
 0x368   :  { %v2404_v21 = vpop.eup %2403  ;;  %v1167_v26 = vmul.f32 %v2402_v50, %v2400_v10  ;;  %v3654_v50 = vld [vmem:[#allocation34_spill] sm:$0xff] }
 0x369   :  { %v2406_v20 = vpop.eup %2405  ;;  %v1150_v30 = vadd.f32 1.0, %v2404_v21 }
 0x36a   :  { %v2408_v13 = vpop.eup %2407  ;;  %v1165_v63 = vmul.f32 %v2406_v20, %v3246_v0 }
 0x36b   :  { %v2410_v34 = vpop.eup %2409 }
 0x36c   :  { %v3302_v19 = vadd.f32 %v1167_v26, %v1165_v63  ;;  %v1168_v28 = vmul.f32 %v2410_v34, %v2408_v13  ;;  %v3655_v13 = vld [vmem:[#allocation36_spill] sm:$0xff] }
 0x36d   :  { %v2412_v29 = vpop.eup %2411 }
 0x36e   :  { %v1166_v33 = vmul.f32 %v2412_v29, %v3250_v32  ;;  %2415 = vtanh.f32 %v3302_v19  ;;  %v2414_v36 = vpop.eup %2413  ;;  %v3310_v32 = vld [vmem:[#allocation11 + $0xe8] ss:$16 sps:$4 sm:$0xff]  }
 0x36f   :  { %2417 = vrcp.f32 %v1150_v30  ;;  %v3657_v30 = vld [vmem:[#allocation51_spill] sm:$0xff] }
 0x370   :  { %v3306_v35 = vadd.f32 %v1168_v28, %v1166_v33 }
 0x372   :  { %2419 = vtanh.f32 %v3306_v35 }
 0x37b   :  { %v2416_v39 = vpop.eup %2415 }
 0x37c   :  { %v2418_v0 = vpop.eup %2417  ;;  %v1173_v41 = vmul.f32 %v2416_v39, %v2414_v36  ;;  %v3658_v39 = vld [vmem:[#allocation49_spill] sm:$0xff] }
 0x37f   :  { %v2420_v40 = vpop.eup %2419 }
 0x380   :  { %v1174_v42 = vmul.f32 %v2420_v40, %v2418_v0 }
 0x382   :  { %v1186_v43 = vpack.c.bf16 %v1174_v42, %v1173_v41 }
 0x384   :  { %1220 = vmatmul.mubr.bf16.vlgmr.msra.gmra.mxu0 %v1186_v43  ;;  %1263 = vmatmul.mubr.bf16.vlgmr.msra.gmra.mxu1 %v1186_v43 }
 0x385   :  { %1342 = vmatpush1.bf16.msra.mxu0 %v3253_v9  ;;  %1385 = vmatpush1.bf16.msra.mxu1 %v3310_v32 }
 0x386   :  { %1343 = vmatprep.subr.bf16.mxu0 %v3313_v45  ;;  %1386 = vmatprep.subr.bf16.mxu1 %v3316_v46 }
 0x387   :  { %1373 = vmatprep.mubr.bf16.mxu0 %v3640_v4  ;;  %1416 = vmatprep.mubr.bf16.mxu1 %v3640_v4 }
 0x389   :  { %1344 = vmatpush1.bf16.msra.mxu0 %v3321_v47  ;;  %1387 = vmatpush1.bf16.msra.mxu1 %v3324_v48 }
 0x38a   :  { %1345 = vmatprep.subr.bf16.mxu0 %v3327_v51  ;;  %1388 = vmatprep.subr.bf16.mxu1 %v3330_v52 }
 0x38d   :  { %1346 = vmatpush1.bf16.msra.mxu0 %v3333_v53  ;;  %1389 = vmatpush1.bf16.msra.mxu1 %v3336_v54 }
 0x38e   :  { %1347 = vmatprep.subr.bf16.mxu0 %v3339_v56  ;;  %1390 = vmatprep.subr.bf16.mxu1 %v3342_v57 }
 0x391   :  { %1348 = vmatpush1.bf16.msra.mxu0 %v3345_v58  ;;  %1391 = vmatpush1.bf16.msra.mxu1 %v3348_v44 }
 0x392   :  { %1349 = vmatprep.subr.bf16.mxu0 %v3351_v60  ;;  %1392 = vmatprep.subr.bf16.mxu1 %v3354_v22 }
 0x395   :  { %1350 = vmatpush1.bf16.msra.mxu0 %v3357_v6  ;;  %1393 = vmatpush1.bf16.msra.mxu1 %v3360_v11 }
 0x396   :  { %1351 = vmatprep.subr.bf16.mxu0 %v3363_v16  ;;  %1394 = vmatprep.subr.bf16.mxu1 %v3366_v5 }
 0x399   :  { %1352 = vmatpush1.bf16.msra.mxu0 %v3369_v15  ;;  %1395 = vmatpush1.bf16.msra.mxu1 %v2923_v61 }
 0x39a   :  { %1353 = vmatprep.subr.bf16.mxu0 %v3373_v59  ;;  %1396 = vmatprep.subr.bf16.mxu1 %v2926_v62  ;;  %v3652_v62 = vld [vmem:[#allocation31_spill] sm:$0xff] }
 0x39d   :  { %1354 = vmatpush1.bf16.msra.mxu0 %v3377_v18  ;;  %1397 = vmatpush1.bf16.msra.mxu1 %v2930_v1 }
 0x39e   :  { %1355 = vmatprep.subr.bf16.mxu0 %v3381_v31  ;;  %1398 = vmatprep.subr.bf16.mxu1 %v2933_v2 }
 0x3a1   :  { %1356 = vmatpush1.bf16.msra.mxu0 %v3385_v7  ;;  %1399 = vmatpush1.bf16.msra.mxu1 %v2940_v3 }
 0x3a2   :  { %1495 = vmatprep.subr.bf16.mxu0 %v3287_v23  ;;  %1538 = vmatprep.subr.bf16.mxu1 %v3290_v25 }
 0x444   :  { %v1221_v61 = vpop.f32.mrf.mxu0  ;;  %v1264_v24 = vpop.f32.mrf.mxu1 }
 0x445   :  { %v1273_v49 = vadd.f32 %v1221_v61, %v3652_v62  ;;  %v1275_v28 = vadd.f32 %v1264_v24, %v3656_v27  ;;  %v3659_v62 = vld [vmem:[#allocation53_spill] sm:$0xff] }
 0x446   :  { %v1223_v1 = vpop.f32.mrf.mxu0  ;;  %v1266_v3 = vpop.f32.mrf.mxu1 }
 0x447   :  { %v2169_v14 = vmul.f32 -1.442695, %v1273_v49  ;;  %v1274_v8 = vadd.f32 %v1223_v1, %v3653_v37  ;;  %v2171_v36 = vmul.f32 -1.442695, %v1275_v28  ;;  %v1276_v0 = vadd.f32 %v1266_v3, %v3658_v39 }
 0x448   :  { %v1225_v10 = vpop.f32.mrf.mxu0  ;;  %v1268_v29 = vpop.f32.mrf.mxu1 }
 0x449   :  { %2421 = vpow2.f32 %v2169_v14  ;;  %v2170_v2 = vmul.f32 -1.442695, %v1274_v8  ;;  %v1277_v21 = vadd.f32 %v1225_v10, %v3654_v50  ;;  %v1279_v33 = vadd.f32 %v1268_v29, %v3657_v30 }
 0x44a   :  { %v1227_v26 = vpop.f32.mrf.mxu0  ;;  %v1270_v40 = vpop.f32.mrf.mxu1 }
 0x44b   :  { %2423 = vpow2.f32 %v2170_v2  ;;  %v2172_v20 = vmul.f32 -1.442695, %v1277_v21  ;;  %v1278_v63 = vadd.f32 %v1227_v26, %v3655_v13  ;;  %v2174_v42 = vmul.f32 -1.442695, %v1279_v33 }
 0x44c   :  { %v1280_v49 = vadd.f32 %v1270_v40, %v3659_v62  ;;  %v3438_v62 = vld [vmem:[#allocation11 + $0x28] ss:$16 sps:$4 sm:$0xff]  }
 0x44d   :  { %2425 = vpow2.f32 %v2172_v20  ;;  %v2173_v34 = vmul.f32 -1.442695, %v1278_v63 }
 0x44f   :  { %2427 = vpow2.f32 %v2173_v34 }
 0x450   :  { %2429 = vpow2.f32 %v2171_v36 }
 0x451   :  { %2431 = vtanh.f32 %v1276_v0 }
 0x456   :  { %v2422_v41 = vpop.eup %2421 }
 0x457   :  { %v1299_v43 = vadd.f32 1.0, %v2422_v41 }
 0x458   :  { %v2424_v61 = vpop.eup %2423 }
 0x459   :  { %2433 = vrcp.f32 %v1299_v43  ;;  %v1300_v1 = vadd.f32 1.0, %v2424_v61  ;;  %v3434_v61 = vld [vmem:[#allocation11 + $0x2c] ss:$16 sps:$4 sm:$0xff]  }
 0x45a   :  { %v2426_v14 = vpop.eup %2425  ;;  %2435 = vpow2.f32 %v2174_v42 }
 0x45b   :  { %2437 = vrcp.f32 %v1300_v1  ;;  %v1302_v24 = vadd.f32 1.0, %v2426_v14  ;;  %v3446_v1 = vld [vmem:[#allocation11 + $0x8] ss:$16 sps:$4 sm:$0xff]  }
 0x45c   :  { %v2428_v37 = vpop.eup %2427  ;;  %2439 = vtanh.f32 %v1280_v49  ;;  %v3442_v49 = vld [vmem:[#allocation11 + $0xc] ss:$16 sps:$4 sm:$0xff]  }
 0x45d   :  { %2441 = vrcp.f32 %v1302_v24  ;;  %v1303_v8 = vadd.f32 1.0, %v2428_v37  ;;  %v2430_v10 = vpop.eup %2429  ;;  %v3660_v24 = vld [vmem:[#allocation38_spill] sm:$0xff] }
 0x45e   :  { %v2432_v2 = vpop.eup %2431  ;;  %v1301_v34 = vadd.f32 1.0, %v2430_v10 }
 0x45f   :  { %2443 = vrcp.f32 %v1303_v8 }
 0x460   :  { %2445 = vrcp.f32 %v1301_v34 }
 0x466   :  { %v2434_v50 = vpop.eup %2433 }
 0x467   :  { %v2436_v21 = vpop.eup %2435  ;;  %v1321_v26 = vmul.f32 %v2434_v50, %v2432_v2  ;;  %v3661_v50 = vld [vmem:[#allocation40_spill] sm:$0xff] }
 0x468   :  { %v2438_v3 = vpop.eup %2437  ;;  %v1304_v30 = vadd.f32 1.0, %v2436_v21 }
 0x469   :  { %v2440_v20 = vpop.eup %2439  ;;  %v1319_v13 = vmul.f32 %v2438_v3, %v3302_v19 }
 0x46a   :  { %v2442_v63 = vpop.eup %2441 }
 0x46b   :  { %v3400_v27 = vadd.f32 %v1321_v26, %v1319_v13  ;;  %v1322_v28 = vmul.f32 %v2442_v63, %v2440_v20  ;;  %v3662_v20 = vld [vmem:[#allocation42_spill] sm:$0xff] }
 0x46c   :  { %v2444_v29 = vpop.eup %2443 }
 0x46d   :  { %v1320_v33 = vmul.f32 %v2444_v29, %v3306_v35  ;;  %2447 = vtanh.f32 %v3400_v27  ;;  %v2446_v39 = vpop.eup %2445  ;;  %v3430_v35 = vld [vmem:[#allocation11 + $0x48] ss:$16 sps:$4 sm:$0xff]  }
 0x46e   :  { %2449 = vrcp.f32 %v1304_v30  ;;  %v3663_v29 = vld [vmem:[#allocation44_spill] sm:$0xff] }
 0x46f   :  { %v3404_v36 = vadd.f32 %v1322_v28, %v1320_v33 }
 0x471   :  { %2451 = vtanh.f32 %v3404_v36 }
 0x47a   :  { %v2448_v0 = vpop.eup %2447 }
 0x47b   :  { %v2450_v19 = vpop.eup %2449  ;;  %v1327_v41 = vmul.f32 %v2448_v0, %v2446_v39  ;;  %v3664_v39 = vld [vmem:[#allocation54_spill] sm:$0xff] }
 0x47e   :  { %v2452_v40 = vpop.eup %2451 }
 0x47f   :  { %v1328_v42 = vmul.f32 %v2452_v40, %v2450_v19  ;;  %v3665_v40 = vld [vmem:[#allocation56_spill] sm:$0xff] }
 0x481   :  { %v1340_v43 = vpack.c.bf16 %v1328_v42, %v1327_v41 }
 0x483   :  { %1374 = vmatmul.mubr.bf16.vlgmr.msra.gmra.mxu0 %v1340_v43  ;;  %1417 = vmatmul.mubr.bf16.vlgmr.msra.gmra.mxu1 %v1340_v43  ;;  %v3666_v43 = vld [vmem:[#allocation55_spill] sm:$0xff] }
 0x484   :  { %1496 = vmatpush1.bf16.msra.mxu0 %v3253_v9  ;;  %1539 = vmatpush1.bf16.msra.mxu1 %v3310_v32 }
 0x485   :  { %1497 = vmatprep.subr.bf16.mxu0 %v3313_v45  ;;  %1540 = vmatprep.subr.bf16.mxu1 %v3316_v46 }
 0x486   :  { %1527 = vmatprep.mubr.bf16.mxu0 %v3640_v4  ;;  %1570 = vmatprep.mubr.bf16.mxu1 %v3640_v4 }
 0x488   :  { %1498 = vmatpush1.bf16.msra.mxu0 %v3321_v47  ;;  %1541 = vmatpush1.bf16.msra.mxu1 %v3324_v48 }
 0x489   :  { %1499 = vmatprep.subr.bf16.mxu0 %v3327_v51  ;;  %1542 = vmatprep.subr.bf16.mxu1 %v3330_v52 }
 0x48c   :  { %1500 = vmatpush1.bf16.msra.mxu0 %v3333_v53  ;;  %1543 = vmatpush1.bf16.msra.mxu1 %v3336_v54 }
 0x48d   :  { %1501 = vmatprep.subr.bf16.mxu0 %v3339_v56  ;;  %1544 = vmatprep.subr.bf16.mxu1 %v3342_v57 }
 0x490   :  { %1502 = vmatpush1.bf16.msra.mxu0 %v3345_v58  ;;  %1545 = vmatpush1.bf16.msra.mxu1 %v3348_v44 }
 0x491   :  { %1503 = vmatprep.subr.bf16.mxu0 %v3351_v60  ;;  %1546 = vmatprep.subr.bf16.mxu1 %v3354_v22 }
 0x494   :  { %1504 = vmatpush1.bf16.msra.mxu0 %v3357_v6  ;;  %1547 = vmatpush1.bf16.msra.mxu1 %v3360_v11 }
 0x495   :  { %1505 = vmatprep.subr.bf16.mxu0 %v3363_v16  ;;  %1548 = vmatprep.subr.bf16.mxu1 %v3366_v5 }
 0x498   :  { %1506 = vmatpush1.bf16.msra.mxu0 %v3369_v15  ;;  %1549 = vmatpush1.bf16.msra.mxu1 %v3430_v35 }
 0x499   :  { %1507 = vmatprep.subr.bf16.mxu0 %v3373_v59  ;;  %1550 = vmatprep.subr.bf16.mxu1 %v3434_v61 }
 0x49c   :  { %1508 = vmatpush1.bf16.msra.mxu0 %v3377_v18  ;;  %1551 = vmatpush1.bf16.msra.mxu1 %v3438_v62 }
 0x49d   :  { %1509 = vmatprep.subr.bf16.mxu0 %v3381_v31  ;;  %1552 = vmatprep.subr.bf16.mxu1 %v3442_v49 }
 0x4a0   :  { %1510 = vmatpush1.bf16.msra.mxu0 %v3385_v7  ;;  %1553 = vmatpush1.bf16.msra.mxu1 %v3446_v1 }
 0x4a1   :  { %1649 = vmatprep.subr.bf16.mxu0 %v3287_v23  ;;  %1692 = vmatprep.subr.bf16.mxu1 %v3290_v25 }
 0x543   :  { %v1375_v14 = vpop.f32.mrf.mxu0  ;;  %v1418_v2 = vpop.f32.mrf.mxu1 }
 0x544   :  { %v1427_v37 = vadd.f32 %v1375_v14, %v3660_v24  ;;  %v1429_v0 = vadd.f32 %v1418_v2, %v3664_v39 }
 0x545   :  { %v1377_v8 = vpop.f32.mrf.mxu0  ;;  %v1420_v34 = vpop.f32.mrf.mxu1 }
 0x546   :  { %v2175_v10 = vmul.f32 -1.442695, %v1427_v37  ;;  %v1428_v21 = vadd.f32 %v1377_v8, %v3661_v50  ;;  %v2177_v42 = vmul.f32 -1.442695, %v1429_v0  ;;  %v1430_v14 = vadd.f32 %v1420_v34, %v3666_v43 }
 0x547   :  { %v1379_v26 = vpop.f32.mrf.mxu0  ;;  %v1422_v19 = vpop.f32.mrf.mxu1 }
 0x548   :  { %2453 = vpow2.f32 %v2175_v10  ;;  %v2176_v3 = vmul.f32 -1.442695, %v1428_v21  ;;  %v1431_v13 = vadd.f32 %v1379_v26, %v3662_v20  ;;  %v1433_v41 = vadd.f32 %v1422_v19, %v3665_v40 }
 0x549   :  { %v1381_v63 = vpop.f32.mrf.mxu0  ;;  %v1424_v24 = vpop.f32.mrf.mxu1 }
 0x54a   :  { %2455 = vpow2.f32 %v2176_v3  ;;  %v2178_v28 = vmul.f32 -1.442695, %v1431_v13  ;;  %v1432_v30 = vadd.f32 %v1381_v63, %v3663_v29  ;;  %v2180_v8 = vmul.f32 -1.442695, %v1433_v41 }
 0x54b   :  { %v1434_v21 = vadd.f32 %v1424_v24, %v3147_v55 }
 0x54c   :  { %2457 = vpow2.f32 %v2178_v28  ;;  %v2179_v33 = vmul.f32 -1.442695, %v1432_v30 }
 0x54e   :  { %2459 = vpow2.f32 %v2179_v33 }
 0x54f   :  { %2461 = vpow2.f32 %v2177_v42 }
 0x550   :  { %2463 = vtanh.f32 %v1430_v14 }
 0x555   :  { %v2454_v37 = vpop.eup %2453 }
 0x556   :  { %v1453_v10 = vadd.f32 1.0, %v2454_v37 }
 0x557   :  { %v2456_v50 = vpop.eup %2455 }
 0x558   :  { %2465 = vrcp.f32 %v1453_v10  ;;  %v1454_v26 = vadd.f32 1.0, %v2456_v50 }
 0x559   :  { %v2458_v3 = vpop.eup %2457  ;;  %2467 = vpow2.f32 %v2180_v8 }
 0x55a   :  { %2469 = vrcp.f32 %v1454_v26  ;;  %v1456_v2 = vadd.f32 1.0, %v2458_v3  ;;  %v3667_v3 = vld [vmem:[#allocation46_spill] sm:$0xff] }
 0x55b   :  { %v2460_v20 = vpop.eup %2459  ;;  %2471 = vtanh.f32 %v1434_v21 }
 0x55c   :  { %2473 = vrcp.f32 %v1456_v2  ;;  %v1457_v13 = vadd.f32 1.0, %v2460_v20  ;;  %v2462_v63 = vpop.eup %2461 }
 0x55d   :  { %v2464_v34 = vpop.eup %2463  ;;  %v1455_v19 = vadd.f32 1.0, %v2462_v63 }
 0x55e   :  { %2475 = vrcp.f32 %v1457_v13 }
 0x55f   :  { %2477 = vrcp.f32 %v1455_v19 }
 0x565   :  { %v2466_v28 = vpop.eup %2465 }
 0x566   :  { %v2468_v29 = vpop.eup %2467  ;;  %v1475_v30 = vmul.f32 %v2466_v28, %v2464_v34  ;;  %v3668_v34 = vld [vmem:[#allocation48_spill] sm:$0xff] }
 0x567   :  { %v2470_v33 = vpop.eup %2469  ;;  %v1458_v43 = vadd.f32 1.0, %v2468_v29 }
 0x568   :  { %v2472_v39 = vpop.eup %2471  ;;  %v1473_v55 = vmul.f32 %v2470_v33, %v3400_v27  ;;  %v3669_v33 = vld [vmem:[#allocation50_spill] sm:$0xff] }
 0x569   :  { %v2474_v0 = vpop.eup %2473 }
 0x56a   :  { %v3460_v40 = vadd.f32 %v1475_v30, %v1473_v55  ;;  %v1476_v41 = vmul.f32 %v2474_v0, %v2472_v39 }
 0x56b   :  { %v2476_v42 = vpop.eup %2475 }
 0x56c   :  { %v1474_v14 = vmul.f32 %v2476_v42, %v3404_v36  ;;  %2479 = vtanh.f32 %v3460_v40  ;;  %v2478_v37 = vpop.eup %2477 }
 0x56d   :  { %2481 = vrcp.f32 %v1458_v43 }
 0x56e   :  { %v3464_v24 = vadd.f32 %v1476_v41, %v1474_v14 }
 0x570   :  { %2483 = vtanh.f32 %v3464_v24 }
 0x579   :  { %v2480_v8 = vpop.eup %2479 }
 0x57a   :  { %v2482_v27 = vpop.eup %2481  ;;  %v1481_v50 = vmul.f32 %v2480_v8, %v2478_v37 }
 0x57d   :  { %v2484_v10 = vpop.eup %2483 }
 0x57e   :  { %v1482_v21 = vmul.f32 %v2484_v10, %v2482_v27 }
 0x580   :  { %v1494_v26 = vpack.c.bf16 %v1482_v21, %v1481_v50 }
 0x582   :  { %1528 = vmatmul.mubr.bf16.vlgmr.msra.gmra.mxu0 %v1494_v26  ;;  %1571 = vmatmul.mubr.bf16.vlgmr.msra.gmra.mxu1 %v1494_v26 }
 0x583   :  { %1650 = vmatpush1.bf16.msra.mxu0 %v3253_v9  ;;  %1693 = vmatpush1.bf16.msra.mxu1 %v3310_v32 }
 0x584   :  { %1651 = vmatprep.subr.bf16.mxu0 %v3313_v45  ;;  %1694 = vmatprep.subr.bf16.mxu1 %v3316_v46 }
 0x585   :  { %1681 = vmatprep.mubr.bf16.mxu0 %v3640_v4  ;;  %1724 = vmatprep.mubr.bf16.mxu1 %v3640_v4 }
 0x587   :  { %1652 = vmatpush1.bf16.msra.mxu0 %v3321_v47  ;;  %1695 = vmatpush1.bf16.msra.mxu1 %v3324_v48 }
 0x588   :  { %1653 = vmatprep.subr.bf16.mxu0 %v3327_v51  ;;  %1696 = vmatprep.subr.bf16.mxu1 %v3330_v52 }
 0x58b   :  { %1654 = vmatpush1.bf16.msra.mxu0 %v3333_v53  ;;  %1697 = vmatpush1.bf16.msra.mxu1 %v3336_v54 }
 0x58c   :  { %1655 = vmatprep.subr.bf16.mxu0 %v3339_v56  ;;  %1698 = vmatprep.subr.bf16.mxu1 %v3342_v57 }
 0x58f   :  { %1656 = vmatpush1.bf16.msra.mxu0 %v3345_v58  ;;  %1699 = vmatpush1.bf16.msra.mxu1 %v3348_v44 }
 0x590   :  { %1657 = vmatprep.subr.bf16.mxu0 %v3351_v60  ;;  %1700 = vmatprep.subr.bf16.mxu1 %v3354_v22 }
 0x593   :  { %1658 = vmatpush1.bf16.msra.mxu0 %v3357_v6  ;;  %1701 = vmatpush1.bf16.msra.mxu1 %v3360_v11 }
 0x594   :  { %1659 = vmatprep.subr.bf16.mxu0 %v3363_v16  ;;  %1702 = vmatprep.subr.bf16.mxu1 %v3366_v5 }
 0x597   :  { %1660 = vmatpush1.bf16.msra.mxu0 %v3369_v15  ;;  %1703 = vmatpush1.bf16.msra.mxu1 %v3430_v35 }
 0x598   :  { %1661 = vmatprep.subr.bf16.mxu0 %v3373_v59  ;;  %1704 = vmatprep.subr.bf16.mxu1 %v3434_v61 }
 0x59b   :  { %1662 = vmatpush1.bf16.msra.mxu0 %v3377_v18  ;;  %1705 = vmatpush1.bf16.msra.mxu1 %v3438_v62 }
 0x59c   :  { %1663 = vmatprep.subr.bf16.mxu0 %v3381_v31  ;;  %1706 = vmatprep.subr.bf16.mxu1 %v3442_v49 }
 0x59f   :  { %1664 = vmatpush1.bf16.msra.mxu0 %v3385_v7  ;;  %1707 = vmatpush1.bf16.msra.mxu1 %v3446_v1 }
 0x5a0   :  { %1803 = vmatprep.subr.bf16.mxu0 %v3287_v23  ;;  %1846 = vmatprep.subr.bf16.mxu1 %v3290_v25  ;;  %v3670_v23 = vld [vmem:[#allocation52_spill] sm:$0xff] }
 0x642   :  { %v1529_v36 = vpop.f32.mrf.mxu0  ;;  %v1572_v63 = vpop.f32.mrf.mxu1 }
 0x643   :  { %v1581_v2 = vadd.f32 %v1529_v36, %v3667_v3  ;;  %v1583_v42 = vadd.f32 %v1572_v63, %v3152_v12  ;;  %v3671_v36 = vld [vmem:[#allocation57_spill] sm:$0xff] }
 0x644   :  { %v1531_v20 = vpop.f32.mrf.mxu0  ;;  %v1574_v0 = vpop.f32.mrf.mxu1 }
 0x645   :  { %v2181_v13 = vmul.f32 -1.442695, %v1581_v2  ;;  %v1582_v28 = vadd.f32 %v1531_v20, %v3668_v34  ;;  %v2183_v37 = vmul.f32 -1.442695, %v1583_v42  ;;  %v1584_v8 = vadd.f32 %v1574_v0, %v3157_v38 }
 0x646   :  { %v1533_v29 = vpop.f32.mrf.mxu0  ;;  %v1576_v43 = vpop.f32.mrf.mxu1 }
 0x647   :  { %2485 = vpow2.f32 %v2181_v13  ;;  %v2182_v30 = vmul.f32 -1.442695, %v1582_v28  ;;  %v1585_v39 = vadd.f32 %v1533_v29, %v3669_v33  ;;  %v1587_v14 = vadd.f32 %v1576_v43, %v3160_v17 }
 0x648   :  { %v1535_v55 = vpop.f32.mrf.mxu0  ;;  %v1578_v27 = vpop.f32.mrf.mxu1 }
 0x649   :  { %2487 = vpow2.f32 %v2182_v30  ;;  %v2184_v19 = vmul.f32 -1.442695, %v1585_v39  ;;  %v1586_v41 = vadd.f32 %v1535_v55, %v3670_v23  ;;  %v2186_v50 = vmul.f32 -1.442695, %v1587_v14 }
 0x64a   :  { %v1588_v3 = vadd.f32 %v1578_v27, %v3671_v36 }
 0x64b   :  { %2489 = vpow2.f32 %v2184_v19  ;;  %v2185_v25 = vmul.f32 -1.442695, %v1586_v41 }
 0x64d   :  { %2491 = vpow2.f32 %v2185_v25 }
 0x64e   :  { %2493 = vpow2.f32 %v2183_v37 }
 0x64f   :  { %2495 = vtanh.f32 %v1584_v8 }
 0x654   :  { %v2486_v10 = vpop.eup %2485 }
 0x655   :  { %v1607_v21 = vadd.f32 1.0, %v2486_v10 }
 0x656   :  { %v2488_v26 = vpop.eup %2487 }
 0x657   :  { %2497 = vrcp.f32 %v1607_v21  ;;  %v1608_v2 = vadd.f32 1.0, %v2488_v26 }
 0x658   :  { %v2490_v20 = vpop.eup %2489  ;;  %2499 = vpow2.f32 %v2186_v50 }
 0x659   :  { %2501 = vrcp.f32 %v1608_v2  ;;  %v1610_v12 = vadd.f32 1.0, %v2490_v20 }
 0x65a   :  { %v2492_v13 = vpop.eup %2491  ;;  %2503 = vtanh.f32 %v1588_v3 }
 0x65b   :  { %2505 = vrcp.f32 %v1610_v12  ;;  %v1611_v17 = vadd.f32 1.0, %v2492_v13  ;;  %v2494_v38 = vpop.eup %2493 }
 0x65c   :  { %v2496_v63 = vpop.eup %2495  ;;  %v1609_v0 = vadd.f32 1.0, %v2494_v38 }
 0x65d   :  { %2507 = vrcp.f32 %v1611_v17 }
 0x65e   :  { %2509 = vrcp.f32 %v1609_v0 }
 0x664   :  { %v2498_v34 = vpop.eup %2497 }
 0x665   :  { %v2500_v28 = vpop.eup %2499  ;;  %v1629_v29 = vmul.f32 %v2498_v34, %v2496_v63 }
 0x666   :  { %v2502_v30 = vpop.eup %2501  ;;  %v1612_v25 = vadd.f32 1.0, %v2500_v28 }
 0x667   :  { %v2504_v33 = vpop.eup %2503  ;;  %v1627_v39 = vmul.f32 %v2502_v30, %v3460_v40 }
 0x668   :  { %v2506_v55 = vpop.eup %2505 }
 0x669   :  { %v3510_v19 = vadd.f32 %v1629_v29, %v1627_v39  ;;  %v1630_v23 = vmul.f32 %v2506_v55, %v2504_v33 }
 0x66a   :  { %v2508_v41 = vpop.eup %2507 }
 0x66b   :  { %v1628_v42 = vmul.f32 %v2508_v41, %v3464_v24  ;;  %2511 = vtanh.f32 %v3510_v19  ;;  %v2510_v14 = vpop.eup %2509  ;;  %v3679_v24 = vld [vmem:[#allocation61_spill] sm:$0xff] }
 0x66c   :  { %2513 = vrcp.f32 %v1612_v25 }
 0x66d   :  { %v3514_v43 = vadd.f32 %v1630_v23, %v1628_v42 }
 0x66f   :  { %2515 = vtanh.f32 %v3514_v43 }
 0x678   :  { %v2512_v37 = vpop.eup %2511 }
 0x679   :  { %v2514_v40 = vpop.eup %2513  ;;  %v1635_v27 = vmul.f32 %v2512_v37, %v2510_v14 }
 0x67c   :  { %v2516_v8 = vpop.eup %2515 }
 0x67d   :  { %v1636_v10 = vmul.f32 %v2516_v8, %v2514_v40 }
 0x67f   :  { %v1648_v50 = vpack.c.bf16 %v1636_v10, %v1635_v27  ;;  %v2317_v10 = vld [vmem:[#allocation13 + $0x38] sm:$0xff]  }
 0x681   :  { %1682 = vmatmul.mubr.bf16.vlgmr.msra.gmra.mxu0 %v1648_v50  ;;  %1725 = vmatmul.mubr.bf16.vlgmr.msra.gmra.mxu1 %v1648_v50  ;;  %v2754_v50 = vmov 0.0  }
 0x682   :  { %1804 = vmatpush1.bf16.msra.mxu0 %v3253_v9  ;;  %1847 = vmatpush1.bf16.msra.mxu1 %v3310_v32  ;;  %v3672_v9 = vld [vmem:[#allocation19_spill] sm:$0xff] }
 0x683   :  { %1805 = vmatprep.subr.bf16.mxu0 %v3313_v45  ;;  %1848 = vmatprep.subr.bf16.mxu1 %v3316_v46 }
 0x684   :  { %1835 = vmatprep.mubr.bf16.mxu0 %v3640_v4  ;;  %1878 = vmatprep.mubr.bf16.mxu1 %v3640_v4 }
 0x686   :  { %1806 = vmatpush1.bf16.msra.mxu0 %v3321_v47  ;;  %1849 = vmatpush1.bf16.msra.mxu1 %v3324_v48  ;;  %v3673_v48 = vld [vmem:[#allocation20_spill] sm:$0xff] }
 0x687   :  { %1807 = vmatprep.subr.bf16.mxu0 %v3327_v51  ;;  %1850 = vmatprep.subr.bf16.mxu1 %v3330_v52 }
 0x68a   :  { %1808 = vmatpush1.bf16.msra.mxu0 %v3333_v53  ;;  %1851 = vmatpush1.bf16.msra.mxu1 %v3336_v54  ;;  %v3674_v54 = vld [vmem:[#allocation21_spill] sm:$0xff] }
 0x68b   :  { %1809 = vmatprep.subr.bf16.mxu0 %v3339_v56  ;;  %1852 = vmatprep.subr.bf16.mxu1 %v3342_v57 }
 0x68e   :  { %1810 = vmatpush1.bf16.msra.mxu0 %v3345_v58  ;;  %1853 = vmatpush1.bf16.msra.mxu1 %v3348_v44 }
 0x68f   :  { %1811 = vmatprep.subr.bf16.mxu0 %v3351_v60  ;;  %1854 = vmatprep.subr.bf16.mxu1 %v3354_v22  ;;  %v3675_v60 = vld [vmem:[#allocation22_spill] sm:$0xff] }
 0x692   :  { %1812 = vmatpush1.bf16.msra.mxu0 %v3357_v6  ;;  %1855 = vmatpush1.bf16.msra.mxu1 %v3360_v11  ;;  %v3676_v11 = vld [vmem:[#allocation58_spill] sm:$0xff] }
 0x693   :  { %1813 = vmatprep.subr.bf16.mxu0 %v3363_v16  ;;  %1856 = vmatprep.subr.bf16.mxu1 %v3366_v5 }
 0x696   :  { %1814 = vmatpush1.bf16.msra.mxu0 %v3369_v15  ;;  %1857 = vmatpush1.bf16.msra.mxu1 %v3430_v35  ;;  %v3677_v15 = vld [vmem:[#allocation60_spill] sm:$0xff] }
 0x697   :  { %1815 = vmatprep.subr.bf16.mxu0 %v3373_v59  ;;  %1858 = vmatprep.subr.bf16.mxu1 %v3434_v61 }
 0x69a   :  { %1816 = vmatpush1.bf16.msra.mxu0 %v3377_v18  ;;  %1859 = vmatpush1.bf16.msra.mxu1 %v3438_v62 }
 0x69b   :  { %1817 = vmatprep.subr.bf16.mxu0 %v3381_v31  ;;  %1860 = vmatprep.subr.bf16.mxu1 %v3442_v49  ;;  %v3678_v31 = vld [vmem:[#allocation59_spill] sm:$0xff] }
 0x69e   :  { %1818 = vmatpush1.bf16.msra.mxu0 %v3385_v7  ;;  %1861 = vmatpush1.bf16.msra.mxu1 %v3446_v1 }
 0x69f   :  { %2217 = vmatprep.subr.bf16.mxu0 %v2754_v50 }
 0x741   :  { %v1683_v4 = vpop.f32.mrf.mxu0  ;;  %v1726_v47 = vpop.f32.mrf.mxu1 }
 0x742   :  { %v1735_v32 = vadd.f32 %v1683_v4, %v3672_v9  ;;  %v1737_v16 = vadd.f32 %v1726_v47, %v3676_v11  ;;  %v2319_v4 = vld [vmem:[#allocation13 + $0x28] sm:$0xff]   ;;  %v2320_v9 = vld [vmem:[#allocation13 + $0x20] sm:$0xff]  }
 0x743   :  { %v1685_v45 = vpop.f32.mrf.mxu0  ;;  %v1728_v58 = vpop.f32.mrf.mxu1  ;;  %v2324_v47 = vld [vmem:[#allocation13] sm:$0xff]  }
 0x744   :  { %v2187_v46 = vmul.f32 -1.442695, %v1735_v32  ;;  %v1736_v51 = vadd.f32 %v1685_v45, %v3673_v48  ;;  %v2189_v18 = vmul.f32 -1.442695, %v1737_v16  ;;  %v1738_v7 = vadd.f32 %v1728_v58, %v3678_v31  ;;  %v2321_v32 = vld [vmem:[#allocation13 + $0x18] sm:$0xff]   ;;  %v2322_v45 = vld [vmem:[#allocation13 + $0x10] sm:$0xff]  }
 0x745   :  { %v1687_v52 = vpop.f32.mrf.mxu0  ;;  %v1730_v5 = vpop.f32.mrf.mxu1  ;;  %v3684_v31 = vld [vmem:[#allocation62_spill] sm:$0xff] }
 0x746   :  { %2517 = vpow2.f32 %v2187_v46  ;;  %v2188_v53 = vmul.f32 -1.442695, %v1736_v51  ;;  %v1739_v56 = vadd.f32 %v1687_v52, %v3674_v54  ;;  %v1741_v59 = vadd.f32 %v1730_v5, %v3677_v15  ;;  %v2323_v46 = vld [vmem:[#allocation13 + $0x8] sm:$0xff]   ;;  %v3680_v51 = vld [vmem:[#allocation23_spill] sm:$0xff] }
 0x747   :  { %v1689_v57 = vpop.f32.mrf.mxu0  ;;  %v1732_v35 = vpop.f32.mrf.mxu1  ;;  %v3683_v15 = vld [vmem:[#allocation26_spill] sm:$0xff] }
 0x748   :  { %2519 = vpow2.f32 %v2188_v53  ;;  %v2190_v44 = vmul.f32 -1.442695, %v1739_v56  ;;  %v1740_v22 = vadd.f32 %v1689_v57, %v3675_v60  ;;  %v2192_v62 = vmul.f32 -1.442695, %v1741_v59  ;;  %v3681_v57 = vld [vmem:[#allocation24_spill] sm:$0xff] }
 0x749   :  { %v1742_v21 = vadd.f32 %v1732_v35, %v3679_v24 }
 0x74a   :  { %2521 = vpow2.f32 %v2190_v44  ;;  %v2191_v6 = vmul.f32 -1.442695, %v1740_v22  ;;  %v3682_v22 = vld [vmem:[#allocation25_spill] sm:$0xff] }
 0x74c   :  { %2523 = vpow2.f32 %v2191_v6 }
 0x74d   :  { %2525 = vpow2.f32 %v2189_v18 }
 0x74e   :  { %2527 = vtanh.f32 %v1738_v7 }
 0x753   :  { %v2518_v61 = vpop.eup %2517 }
 0x754   :  { %v1761_v49 = vadd.f32 1.0, %v2518_v61  ;;  %v3685_v61 = vld [vmem:[#allocation64_spill] sm:$0xff] }
 0x755   :  { %v2520_v1 = vpop.eup %2519 }
 0x756   :  { %2529 = vrcp.f32 %v1761_v49  ;;  %v1762_v26 = vadd.f32 1.0, %v2520_v1  ;;  %v3686_v1 = vld [vmem:[#allocation63_spill] sm:$0xff] }
 0x757   :  { %v2522_v36 = vpop.eup %2521  ;;  %2531 = vpow2.f32 %v2192_v62 }
 0x758   :  { %2533 = vrcp.f32 %v1762_v26  ;;  %v1764_v3 = vadd.f32 1.0, %v2522_v36 }
 0x759   :  { %v2524_v2 = vpop.eup %2523  ;;  %2535 = vtanh.f32 %v1742_v21 }
 0x75a   :  { %2537 = vrcp.f32 %v1764_v3  ;;  %v1765_v20 = vadd.f32 1.0, %v2524_v2  ;;  %v2526_v12 = vpop.eup %2525 }
 0x75b   :  { %v2528_v13 = vpop.eup %2527  ;;  %v1763_v33 = vadd.f32 1.0, %v2526_v12 }
 0x75c   :  { %2539 = vrcp.f32 %v1765_v20  ;;  %v3687_v20 = vld [vmem:[#allocation65_spill] sm:$0xff] }
 0x75d   :  { %2541 = vrcp.f32 %v1763_v33 }
 0x763   :  { %v2530_v17 = vpop.eup %2529 }
 0x764   :  { %v2532_v38 = vpop.eup %2531  ;;  %v1783_v63 = vmul.f32 %v2530_v17, %v2528_v13 }
 0x765   :  { %v2534_v34 = vpop.eup %2533  ;;  %v1766_v23 = vadd.f32 1.0, %v2532_v38 }
 0x766   :  { %v2536_v28 = vpop.eup %2535  ;;  %v1781_v29 = vmul.f32 %v2534_v34, %v3510_v19 }
 0x767   :  { %v2538_v30 = vpop.eup %2537 }
 0x768   :  { %v3558_v39 = vadd.f32 %v1783_v63, %v1781_v29  ;;  %v1784_v55 = vmul.f32 %v2538_v30, %v2536_v28 }
 0x769   :  { %v2540_v0 = vpop.eup %2539 }
 0x76a   :  { %v1782_v41 = vmul.f32 %v2540_v0, %v3514_v43  ;;  %2543 = vtanh.f32 %v3558_v39  ;;  %v2542_v42 = vpop.eup %2541  ;;  %v2318_v43 = vld [vmem:[#allocation13 + $0x30] sm:$0xff]  }
 0x76b   :  { %2545 = vrcp.f32 %v1766_v23 }
 0x76c   :  { %v3562_v25 = vadd.f32 %v1784_v55, %v1782_v41 }
 0x76e   :  { %2547 = vtanh.f32 %v3562_v25 }
 0x777   :  { %v2544_v14 = vpop.eup %2543 }
 0x778   :  { %v2546_v19 = vpop.eup %2545  ;;  %v1789_v40 = vmul.f32 %v2544_v14, %v2542_v42 }
 0x77b   :  { %v2548_v37 = vpop.eup %2547 }
 0x77c   :  { %v1790_v8 = vmul.f32 %v2548_v37, %v2546_v19 }
 0x77e   :  { %v1802_v27 = vpack.c.bf16 %v1790_v8, %v1789_v40 }
 0x780   :  { %1836 = vmatmul.mubr.bf16.vlgmr.msra.gmra.mxu0 %v1802_v27  ;;  %1879 = vmatmul.mubr.bf16.vlgmr.msra.gmra.mxu1 %v1802_v27 }
 0x781   :  { %2218 = vmatpush3.bf16.msra.mxu0 %v2317_v10  ;;  %2233 = vmatprep.mubr.msk.bf16.mxu0 %vm2755_vm2, %v2754_v50 }
 0x782   :  { %2219 = vmatprep.subr.bf16.mxu0 %v2754_v50 }
 0x785   :  { %2220 = vmatpush3.bf16.msra.mxu0 %v2318_v43 }
 0x786   :  { %2221 = vmatprep.subr.bf16.mxu0 %v2754_v50 }
 0x789   :  { %2222 = vmatpush3.bf16.msra.mxu0 %v2319_v4 }
 0x78a   :  { %2223 = vmatprep.subr.bf16.mxu0 %v2754_v50 }
 0x78d   :  { %2224 = vmatpush3.bf16.msra.mxu0 %v2320_v9 }
 0x78e   :  { %2225 = vmatprep.subr.bf16.mxu0 %v2754_v50 }
 0x791   :  { %2226 = vmatpush3.bf16.msra.mxu0 %v2321_v32 }
 0x792   :  { %2227 = vmatprep.subr.bf16.mxu0 %v2754_v50 }
 0x795   :  { %2228 = vmatpush3.bf16.msra.mxu0 %v2322_v45 }
 0x796   :  { %2229 = vmatprep.subr.bf16.mxu0 %v2754_v50 }
 0x799   :  { %2230 = vmatpush3.bf16.msra.mxu0 %v2323_v46 }
 0x79a   :  { %2231 = vmatprep.subr.bf16.mxu0 %v2754_v50 }
 0x79d   :  { %2232 = vmatpush3.bf16.msra.mxu0 %v2324_v47 }
 0x840   :  { %v1837_v48 = vpop.f32.mrf.mxu0  ;;  %v1880_v56 = vpop.f32.mrf.mxu1 }
 0x841   :  { %v1889_v52 = vadd.f32 %v1837_v48, %v3680_v51  ;;  %v1891_v7 = vadd.f32 %v1880_v56, %v3684_v31 }
 0x842   :  { %v1839_v53 = vpop.f32.mrf.mxu0  ;;  %v1882_v16 = vpop.f32.mrf.mxu1 }
 0x843   :  { %v2193_v54 = vmul.f32 -1.442695, %v1889_v52  ;;  %v1890_v58 = vadd.f32 %v1839_v53, %v3681_v57  ;;  %v2195_v49 = vmul.f32 -1.442695, %v1891_v7  ;;  %v1892_v24 = vadd.f32 %v1882_v16, %v3686_v1 }
 0x844   :  { %v1841_v44 = vpop.f32.mrf.mxu0  ;;  %v1884_v35 = vpop.f32.mrf.mxu1 }
 0x845   :  { %2549 = vpow2.f32 %v2193_v54  ;;  %v2194_v60 = vmul.f32 -1.442695, %v1890_v58  ;;  %v1893_v6 = vadd.f32 %v1841_v44, %v3682_v22  ;;  %v1895_v62 = vadd.f32 %v1884_v35, %v3685_v61 }
 0x846   :  { %v1843_v11 = vpop.f32.mrf.mxu0  ;;  %v1886_v21 = vpop.f32.mrf.mxu1 }
 0x847   :  { %2551 = vpow2.f32 %v2194_v60  ;;  %v2196_v5 = vmul.f32 -1.442695, %v1893_v6  ;;  %v1894_v59 = vadd.f32 %v1843_v11, %v3683_v15  ;;  %v2198_v36 = vmul.f32 -1.442695, %v1895_v62 }
 0x848   :  { %v1896_v12 = vadd.f32 %v1886_v21, %v3687_v20 }
 0x849   :  { %2553 = vpow2.f32 %v2196_v5  ;;  %v2197_v18 = vmul.f32 -1.442695, %v1894_v59 }
 0x84b   :  { %2555 = vpow2.f32 %v2197_v18 }
 0x84c   :  { %2557 = vpow2.f32 %v2195_v49 }
 0x84d   :  { %2559 = vtanh.f32 %v1892_v24 }
 0x852   :  { %v2550_v26 = vpop.eup %2549 }
 0x853   :  { %v1915_v3 = vadd.f32 1.0, %v2550_v26 }
 0x854   :  { %v2552_v2 = vpop.eup %2551 }
 0x855   :  { %2561 = vrcp.f32 %v1915_v3  ;;  %v1916_v13 = vadd.f32 1.0, %v2552_v2 }
 0x856   :  { %v2554_v17 = vpop.eup %2553  ;;  %2563 = vpow2.f32 %v2198_v36 }
 0x857   :  { %2565 = vrcp.f32 %v1916_v13  ;;  %v1918_v38 = vadd.f32 1.0, %v2554_v17 }
 0x858   :  { %v2556_v63 = vpop.eup %2555  ;;  %2567 = vtanh.f32 %v1896_v12 }
 0x859   :  { %2569 = vrcp.f32 %v1918_v38  ;;  %v1919_v34 = vadd.f32 1.0, %v2556_v63  ;;  %v2558_v28 = vpop.eup %2557 }
 0x85a   :  { %v2560_v29 = vpop.eup %2559  ;;  %v1917_v23 = vadd.f32 1.0, %v2558_v28 }
 0x85b   :  { %2571 = vrcp.f32 %v1919_v34 }
 0x85c   :  { %2573 = vrcp.f32 %v1917_v23 }
 0x862   :  { %v2562_v30 = vpop.eup %2561 }
 0x863   :  { %v2564_v33 = vpop.eup %2563  ;;  %v1937_v55 = vmul.f32 %v2562_v30, %v2560_v29 }
 0x864   :  { %v2566_v0 = vpop.eup %2565  ;;  %v1920_v8 = vadd.f32 1.0, %v2564_v33 }
 0x865   :  { %v2568_v41 = vpop.eup %2567  ;;  %v1935_v42 = vmul.f32 %v2566_v0, %v3558_v39  ;;  %v2199_v39 = vld [vmem:[%s3589_s5] ss:$0 sm:$0xff] }
 0x866   :  { %v2570_v14 = vpop.eup %2569 }
 0x867   :  { %v1939_v19 = vadd.f32 %v1937_v55, %v1935_v42  ;;  %v1938_v37 = vmul.f32 %v2570_v14, %v2568_v41 }
 0x868   :  { %v2572_v40 = vpop.eup %2571 }
 0x869   :  { %2575 = vtanh.f32 %v1939_v19  ;;  %v1936_v27 = vmul.f32 %v2572_v40, %v3562_v25  ;;  %v2574_v50 = vpop.eup %2573 }
 0x86a   :  { %2577 = vrcp.f32 %v1920_v8 }
 0x86b   :  { %v1940_v10 = vadd.f32 %v1938_v37, %v1936_v27 }
 0x86d   :  { %2579 = vtanh.f32 %v1940_v10 }
 0x876   :  { %v2576_v43 = vpop.eup %2575 }
 0x877   :  { %v1943_v4 = vmul.f32 %v2576_v43, %v2574_v50  ;;  %v2578_v9 = vpop.eup %2577 }
 0x87a   :  { %v2580_v32 = vpop.eup %2579 }
 0x87b   :  { %v1944_v45 = vmul.f32 %v2580_v32, %v2578_v9 }
 0x87d   :  { %v1952_v46 = vpack.c.bf16 %v1944_v45, %v1943_v4 }
 0x87f   :  { %2234 = vmatmul.mubr.bf16.vlgmr.msra.gmra.mxu0 %v1952_v46 }
 0x93f   :  { %v2058_v47 = vpop.f32.mrf.mxu0 }
 0x940   :  { %v2059_v48 = vadd.f32 %v2199_v39, %v2058_v47 }
 0x941   :  { %v2235_v51 = vpop.f32.mrf.mxu0 }
 0x942   :  { %2065 = vst [vmem:[#allocation14] sm:$0xff] %v2059_v48 }
 0x943   :  { %v2061_v25 = vpop.f32.mrf.mxu0 }
 0x944   :  { %v2062_v52 = vadd.f32 %v2199_v39, %v2061_v25 }
 0x945   :  { %v2236_v53 = vpop.f32.mrf.mxu0 }
 0x946   :  { %2066 = vst [vmem:[#allocation14 + $0x8] sm:$0xff] %v2062_v52 }
 0x947   :  { %2724 = shalt.err (!%p2721_p1)
}
 0x948   :  { %2078 = dma.vmem_to_hbm [thread:$0]  %s2073_s26, 256, %s3590_s6, [#allocation7], %s2746_s1, %s2746_s1, %s2747_s12  }
 0x949   :  { %2739 = dma.done.wait [#allocation7], 256  }
 0x94a   :  { %2740 = vsyncadd [#allocation7], 4294967040 }
 0x94b   :  { %2082 = vsyncpa [#allocation6], 1 }
 0x94c   :  { %2083 = vsyncpa [#allocation9], 1 }
 0x94d   :  { %2084 = vsyncpa [#allocation12], 1 }
 0x94e   :  { %2085 = vsyncpa [#allocation7], 1 }

</bundles_post_ra>
